<compile_context>
chip_gen: v5e
topology: v5e:2x2
jax: 0.10.0
libtpu: 0.0.40
codegen_flags: <defaults>
</compile_context>

<pallas_src>
import functools
from typing import NamedTuple

import numpy as np
import jax
import jax.numpy as jnp
from jax.experimental import pallas as pl
from jax.experimental.pallas import tpu as pltpu


EMBED_DIM = 512  # matches the docstring example (B, 512)


def _round_up(x, m):
    return ((x + m - 1) // m) * m


class PreparedWeight(NamedTuple):
    array: jax.Array   # (K_pad, E_pad) bf16, zero-padded
    in_dim: int        # original K = C*H*W
    embed_dim: int     # original E


# --------------------------------------------------------------------------
# Kernel
# --------------------------------------------------------------------------
def _embed_diff_kernel(x1_ref, x2_ref, w_ref, o_ref, acc_ref):
    # grid = (E tiles [parallel], K tiles [arbitrary/reduction])
    k = pl.program_id(1)

    @pl.when(k == 0)
    def _():
        acc_ref[...] = jnp.zeros_like(acc_ref)

    # torch.subtract(E(x1), E(x2)) == (x1 - x2) @ W for a linear embedder:
    # one MXU matmul instead of two.  Subtract is exact in f32 (VPU), only the
    # result is rounded to bf16 for the MXU; accumulation stays f32.
    diff = x1_ref[...] - x2_ref[...]
    acc_ref[...] += jnp.dot(diff.astype(w_ref.dtype), w_ref[...],
                            preferred_element_type=jnp.float32)

    @pl.when(k == pl.num_programs(1) - 1)
    def _():
        o_ref[...] = acc_ref[...].astype(o_ref.dtype)


# --------------------------------------------------------------------------
# Tile / VMEM heuristics (all outside the jitted hot path)
# --------------------------------------------------------------------------
@functools.lru_cache(maxsize=1)
def _device_vmem_bytes():
    try:
        info = pltpu.get_tpu_info()
        cap = getattr(info, "vmem_capacity_bytes", None)
        if cap:
            return int(cap)
    except Exception:
        pass
    return 64 * 2**20  # conservative fallback (v7x per-core physical VMEM)


@functools.lru_cache(maxsize=1)
def _device_kind():
    try:
        return jax.devices()[0].device_kind.lower()
    except Exception:
        return ""


def _pick_tk(k_pad, cap=8192):
    """Largest 128-multiple divisor of k_pad that is <= cap (so K_pad % tk == 0)."""
    best = 128
    for t in range(128, min(k_pad, cap) + 1, 128):
        if k_pad % t == 0:
            best = t
    return best


def _pick_tn(e_pad):
    """Single full-width E tile on single-TC chips; 2 E tiles on v7x so both
    TensorCores each stream half of W via the 'parallel' grid axis."""
    if "v7" in _device_kind() and e_pad > 256 and e_pad % 256 == 0:
        return 256
    return e_pad


def _vmem_limit_bytes(b_pad, tk, tn):
    needed = (2 * 2 * b_pad * tk * 4      # x1 + x2 tiles, double-buffered, f32
              + 2 * tk * tn * 2           # W tile (bf16), double-buffered
              + 2 * b_pad * tn * 4        # output tile, double-buffered
              + b_pad * tn * 4            # f32 accumulator
              + b_pad * tk * (4 + 2))     # in-kernel f32 diff + bf16 cast temporaries
    cap = int(_device_vmem_bytes() * 0.55)
    return int(min(cap, max(16 * 2**20, 2 * needed)))


# --------------------------------------------------------------------------
# Jitted device hot path
# --------------------------------------------------------------------------
@functools.partial(jax.jit, static_argnames=("out_dim", "tk", "tn", "vmem_limit"))
def _embed_diff(x1, x2, w_padded, *, out_dim, tk, tn, vmem_limit):
    """(B, K) f32 x1/x2, (K_pad, E_pad) bf16 pre-padded weight -> (B, out_dim) f32."""
    B, K = x1.shape
    K_pad, E_pad = w_padded.shape
    B_pad = _round_up(max(B, 8), 8)

    # Cheap per-call pad of the small activations only (weight is pre-padded).
    x1p = jnp.zeros((B_pad, K_pad), jnp.float32).at[:B, :K].set(x1)
    x2p = jnp.zeros((B_pad, K_pad), jnp.float32).at[:B, :K].set(x2)

    n_e = E_pad // tn
    n_k = K_pad // tk

    out = pl.pallas_call(
        _embed_diff_kernel,
        out_shape=jax.ShapeDtypeStruct((B_pad, E_pad), jnp.float32),
        grid_spec=pltpu.PrefetchScalarGridSpec(
            num_scalar_prefetch=0,
            grid=(n_e, n_k),  # reduction axis last
            in_specs=[
                pl.BlockSpec((B_pad, tk), lambda j, k: (0, k)),   # x1
                pl.BlockSpec((B_pad, tk), lambda j, k: (0, k)),   # x2
                pl.BlockSpec((tk, tn), lambda j, k: (k, j)),      # W
            ],
            out_specs=pl.BlockSpec((B_pad, tn), lambda j, k: (0, j)),
            scratch_shapes=[pltpu.VMEM((B_pad, tn), jnp.float32)],
        ),
        compiler_params=pltpu.CompilerParams(
            dimension_semantics=("parallel", "arbitrary"),
            vmem_limit_bytes=vmem_limit,
        ),
    )(x1p, x2p, w_padded)

    return out[:B, :out_dim]


def embed_diff_device(x1, x2, prepared: PreparedWeight, *, tk_cap=8192):
    """Device-side entry: picks tiles/VMEM budget, returns the (B, E) device array."""
    K_pad, E_pad = prepared.array.shape
    tk = _pick_tk(K_pad, cap=tk_cap)
    tn = _pick_tn(E_pad)
    B = x1.shape[0]
    vmem_limit = _vmem_limit_bytes(_round_up(max(B, 8), 8), tk, tn)
    return _embed_diff(x1, x2, prepared.array,
                       out_dim=prepared.embed_dim,
                       tk=tk, tn=tn, vmem_limit=vmem_limit)


# --------------------------------------------------------------------------
# Module-level API (matches Embedder.forward semantics)
# --------------------------------------------------------------------------
def prepare_embedder_weight(weight, dtype=jnp.bfloat16):
    """One-time weight preparation: cast to bf16 and zero-pad to (8,128)-friendly
    shape.  Do this once and reuse the result across calls (removes the large
    per-call cast/pad HBM traffic)."""
    weight = jnp.asarray(weight)
    K, E = weight.shape
    K_pad = _round_up(K, 128)
    E_pad = _round_up(E, 128)
    wp = jnp.zeros((K_pad, E_pad), dtype).at[:K, :E].set(weight.astype(dtype))
    return PreparedWeight(jax.block_until_ready(wp), K, E)


def embedder_forward(image_1, image_2, prepared_weight: PreparedWeight, *, tk_cap=8192):
    """
    Pallas equivalent of Embedder.forward.

    image_1, image_2: (B, C, H, W) arrays (cast to float32 like `.float()`).
    prepared_weight:  output of prepare_embedder_weight (cached across calls).
    returns:          np.ndarray (B, EMBED_DIM) float32 (matches .cpu().numpy()).
    """
    B = image_1.shape[0]
    K = int(np.prod(image_1.shape[1:]))
    assert K == prepared_weight.in_dim, "weight / image shape mismatch"

    x1 = jnp.asarray(image_1, jnp.float32).reshape(B, K)
    x2 = jnp.asarray(image_2, jnp.float32).reshape(B, K)

    out = embed_diff_device(x1, x2, prepared_weight, tk_cap=tk_cap)
    # Host round-trip only at the API boundary (module semantics return numpy).
    return np.asarray(jax.device_get(out))


def make_embedder_weight(key, in_dim, embed_dim=EMBED_DIM):
    # Deterministic synthetic "pretrained" weights.
    return (jax.random.normal(key, (in_dim, embed_dim), dtype=jnp.float32)
            / jnp.sqrt(jnp.float32(in_dim)))


if __name__ == "__main__":
    # Small shapes consistent with the module's (B, C, H, W) input convention.
    B, C, H, W = 2, 3, 16, 16
    key = jax.random.PRNGKey(0)
    k1, k2, kw = jax.random.split(key, 3)

    image_1 = jax.random.normal(k1, (B, C, H, W), dtype=jnp.float32)
    image_2 = jax.random.normal(k2, (B, C, H, W), dtype=jnp.float32)
    weight = make_embedder_weight(kw, C * H * W, EMBED_DIM)

    # One-time weight prep (cached); the per-call path never re-casts/pads W.
    prepared = prepare_embedder_weight(weight)

    # Device-side run + explicit block.
    x1 = image_1.reshape(B, -1).astype(jnp.float32)
    x2 = image_2.reshape(B, -1).astype(jnp.float32)
    result_dev = embed_diff_device(x1, x2, prepared)
    jax.block_until_ready(result_dev)

    # Full module-equivalent API (returns numpy); second call reuses caches.
    result = embedder_forward(image_1, image_2, prepared)
    result2 = embedder_forward(image_1, image_2, prepared)

    # Reference 1: same bf16-weight / f32-subtract / f32-accumulate math.
    ref_bf16 = np.asarray(jnp.dot((x1 - x2).astype(jnp.bfloat16),
                                  weight.astype(jnp.bfloat16),
                                  preferred_element_type=jnp.float32))
    np.testing.assert_allclose(result, ref_bf16, rtol=1e-4, atol=1e-4)

    # Reference 2: sanity vs. full f32 math (bf16 weight streaming rounding).
    ref_f32 = np.asarray(x1 @ weight - x2 @ weight)
    np.testing.assert_allclose(result, ref_f32, rtol=2e-2, atol=2e-2)

    np.testing.assert_array_equal(result, result2)
    assert result.shape == (B, EMBED_DIM)
    assert result.dtype == np.float32

    print("KERNEL_OK")
</pallas_src>

<mosaic_0001>
module attributes {stable_mosaic.version = 11 : i64} {
  func.func @_embed_diff_kernel(%arg0: i32, %arg1: i32, %arg2: memref<8x768xf32, #tpu.memory_space<vmem>>, %arg3: memref<8x768xf32, #tpu.memory_space<vmem>>, %arg4: memref<768x512xbf16, #tpu.memory_space<vmem>>, %arg5: memref<8x512xf32, #tpu.memory_space<vmem>>, %arg6: memref<8x512xf32, #tpu.memory_space<vmem>>) attributes {dimension_semantics = [#tpu.dimension_semantics<parallel>, #tpu.dimension_semantics<arbitrary>], iteration_bounds = array<i64: 1, 1>, scalar_prefetch = 0 : i64, scratch_operands = 1 : i64, tpu.core_type = #tpu.core_type<tc>, window_params = [{transform_indices = @transform_0, window_bounds = array<i64: 8, 768>}, {transform_indices = @transform_1, window_bounds = array<i64: 8, 768>}, {transform_indices = @transform_2, window_bounds = array<i64: 768, 512>}, {transform_indices = @transform_3, window_bounds = array<i64: 8, 512>}]} {
    %c0_i32 = arith.constant 0 : i32
    %0 = arith.cmpi eq, %arg1, %c0_i32 : i32
    %1 = arith.extui %0 : i1 to i32
    %c0_i32_0 = arith.constant 0 : i32
    %2 = arith.cmpi ne, %1, %c0_i32_0 : i32
    scf.if %2 {
      %cst_12 = arith.constant 0.000000e+00 : f32
      %15 = vector.broadcast %cst_12 : f32 to vector<8x512xf32>
      %c0_13 = arith.constant 0 : index
      %c0_14 = arith.constant 0 : index
      %16 = vector.load %arg6[%c0_13, %c0_14] : memref<8x512xf32, #tpu.memory_space<vmem>>, vector<8x512xf32>
      tpu.vector_store %arg6[%c0_13, %c0_14], %15 {strides = array<i32>} : memref<8x512xf32, #tpu.memory_space<vmem>>, vector<8x512xf32>,
    } else {
    }
    %c0 = arith.constant 0 : index
    %c0_1 = arith.constant 0 : index
    %3 = vector.load %arg2[%c0, %c0_1] : memref<8x768xf32, #tpu.memory_space<vmem>>, vector<8x768xf32>
    %c0_2 = arith.constant 0 : index
    %c0_3 = arith.constant 0 : index
    %4 = vector.load %arg3[%c0_2, %c0_3] : memref<8x768xf32, #tpu.memory_space<vmem>>, vector<8x768xf32>
    %5 = arith.subf %3, %4 : vector<8x768xf32>
    %c0_4 = arith.constant 0 : index
    %c0_5 = arith.constant 0 : index
    %6 = vector.load %arg6[%c0_4, %c0_5] : memref<8x512xf32, #tpu.memory_space<vmem>>, vector<8x512xf32>
    %7 = arith.truncf %5 : vector<8x768xf32> to vector<8x768xbf16>
    %c0_6 = arith.constant 0 : index
    %c0_7 = arith.constant 0 : index
    %8 = vector.load %arg4[%c0_6, %c0_7] : memref<768x512xbf16, #tpu.memory_space<vmem>>, vector<768x512xbf16>
    %cst = arith.constant dense<0.000000e+00> : vector<8x512xf32>
    %9 = tpu.matmul %7, %8, %cst {dimension_numbers = #tpu.dot_dimension_numbers<[1], [0], [0], [1], [0, 0, 1, 1], [], []>} : vector<8x768xbf16>, vector<768x512xbf16>, vector<8x512xf32> -> vector<8x512xf32>
    %10 = arith.addf %6, %9 : vector<8x512xf32>
    %c0_8 = arith.constant 0 : index
    %c0_9 = arith.constant 0 : index
    %11 = vector.load %arg6[%c0_8, %c0_9] : memref<8x512xf32, #tpu.memory_space<vmem>>, vector<8x512xf32>
    tpu.vector_store %arg6[%c0_8, %c0_9], %10 {strides = array<i32>} : memref<8x512xf32, #tpu.memory_space<vmem>>, vector<8x512xf32>,
    %c0_i32_10 = arith.constant 0 : i32
    %12 = arith.cmpi eq, %arg1, %c0_i32_10 : i32
    %13 = arith.extui %12 : i1 to i32
    %c0_i32_11 = arith.constant 0 : i32
    %14 = arith.cmpi ne, %13, %c0_i32_11 : i32
    scf.if %14 {
      %c0_12 = arith.constant 0 : index
      %c0_13 = arith.constant 0 : index
      %15 = vector.load %arg6[%c0_12, %c0_13] : memref<8x512xf32, #tpu.memory_space<vmem>>, vector<8x512xf32>
      %c0_14 = arith.constant 0 : index
      %c0_15 = arith.constant 0 : index
      %16 = vector.load %arg5[%c0_14, %c0_15] : memref<8x512xf32, #tpu.memory_space<vmem>>, vector<8x512xf32>
      tpu.vector_store %arg5[%c0_14, %c0_15], %15 {strides = array<i32>} : memref<8x512xf32, #tpu.memory_space<vmem>>, vector<8x512xf32>,
    } else {
    }
    return
  }
  func.func @transform_0(%arg0: i32, %arg1: i32) -> (i32, i32) {
    %c0_i32 = arith.constant 0 : i32
    %c0_i32_0 = arith.constant 0 : i32
    return %c0_i32, %arg1 : i32, i32
  }
  func.func @transform_1(%arg0: i32, %arg1: i32) -> (i32, i32) {
    %c0_i32 = arith.constant 0 : i32
    %c0_i32_0 = arith.constant 0 : i32
    return %c0_i32, %arg1 : i32, i32
  }
  func.func @transform_2(%arg0: i32, %arg1: i32) -> (i32, i32) {
    %c0_i32 = arith.constant 0 : i32
    return %arg1, %arg0 : i32, i32
  }
  func.func @transform_3(%arg0: i32, %arg1: i32) -> (i32, i32) {
    %c0_i32 = arith.constant 0 : i32
    %c0_i32_0 = arith.constant 0 : i32
    return %c0_i32, %arg0 : i32, i32
  }
}

</mosaic_0001>

<bundles_post_ra>
// kernel: _embed_diff.1
= control target key start
LH: loop header
LB: loop body
LE: loop exit
PB: predicated region body
PF: predicated region fallthrough
CT: control target
= control target key end

     0   :  { %8 = vsyncpa [#allocation4], 0  ;;  %s2543_s15 = smov [#allocation3]   ;;  %s2544_s17 = smov 256   ;;  %s2653_s0 = inlined_call_operand.vmem [shape: f32[8,768], index: 0, kind: input, shape index: {}]   ;;  %s2654_s1 = inlined_call_operand.vmem [shape: f32[8,768], index: 1, kind: input, shape index: {}]   ;;  %s2655_s2 = inlined_call_operand.hbm [shape: bf16[768,512], index: 2, kind: input, shape index: {}]   ;;  %s2656_s3 = inlined_call_operand.vmem [shape: f32[8,512], index: 3, kind: output, shape index: {}]  }
   0x1   :  { %s17_s14 = sshll.u32 %s2655_s2, 4  ;;  %s19_s16 = sshll.u32 %s2543_s15, 4  ;;  %s18_s14 = int_to_ptr.hbm [resolvable:$true] %s17_s14  ;;  %s20_s16 = int_to_ptr.vmem [resolvable:$true] %s19_s16 }
   0x2   :  { %s2545_s18 = smov 16  }
   0x3   :  { %25 = dma.hbm_to_vmem [thread:$0]  %s18_s14, 24576, %s20_s16, [#allocation4], %s2544_s17, %s2544_s17, %s2545_s18  }
   0x4   :  { %2541 = dma.done.wait [#allocation4], 24576  }
   0x5   :  { %2542 = vsyncadd [#allocation4], 4294942720  ;;  %v1668_v0 = vld [vmem:[#allocation3 + $0xe0] sm:$0xf]  ;;  %v2352_v1 = vld [vmem:[#allocation3 + $0xec] sm:$0xf0] }
   0x6   :  { %v1796_v2 = vld [vmem:[#allocation3 + $0x1e0] sm:$0xf]  ;;  %v1669_v3 = vor.u32 %v2352_v1, %v1668_v0  ;;  %v2384_v4 = vld [vmem:[#allocation3 + $0x1ec] sm:$0xf0] }
   0x7   :  { %v1924_v5 = vld [vmem:[#allocation3 + $0x2e0] sm:$0xf]  ;;  %v2416_v6 = vld [vmem:[#allocation3 + $0x2ec] sm:$0xf0]  ;;  %v1797_v7 = vor.u32 %v2384_v4, %v1796_v2 }
   0x8   :  { %v1925_v8 = vor.u32 %v2416_v6, %v1924_v5  ;;  %v2052_v9 = vld [vmem:[#allocation3 + $0x3e0] sm:$0xf]  ;;  %v2448_v10 = vld [vmem:[#allocation3 + $0x3ec] sm:$0xf0]  ;;  %1218 = vmatpush.bf16.msra.mxu0 %v1669_v3 }
   0x9   :  { %v1652_v11 = vld [vmem:[#allocation3 + $0xc0] sm:$0xf]  ;;  %v2053_v12 = vor.u32 %v2448_v10, %v2052_v9  ;;  %v2348_v13 = vld [vmem:[#allocation3 + $0xcc] sm:$0xf0]  ;;  %1231 = vmatpush.bf16.msra.mxu1 %v1797_v7 }
   0xa   :  { %v1780_v14 = vld [vmem:[#allocation3 + $0x1c0] sm:$0xf]  ;;  %v2380_v15 = vld [vmem:[#allocation3 + $0x1cc] sm:$0xf0]  ;;  %1244 = vmatpush.bf16.msra.mxu2 %v1925_v8  ;;  %v1653_v16 = vor.u32 %v2348_v13, %v1652_v11 }
   0xb   :  { %v1781_v17 = vor.u32 %v2380_v15, %v1780_v14  ;;  %v1908_v18 = vld [vmem:[#allocation3 + $0x2c0] sm:$0xf]  ;;  %v2412_v19 = vld [vmem:[#allocation3 + $0x2cc] sm:$0xf0]  ;;  %1257 = vmatpush.bf16.msra.mxu3 %v2053_v12 }
   0xc   :  { %v2036_v20 = vld [vmem:[#allocation3 + $0x3c0] sm:$0xf]  ;;  %v1909_v21 = vor.u32 %v2412_v19, %v1908_v18  ;;  %v2444_v22 = vld [vmem:[#allocation3 + $0x3cc] sm:$0xf0]  ;;  %1219 = vmatpush.bf16.msra.mxu0 %v1653_v16 }
   0xd   :  { %v1636_v23 = vld [vmem:[#allocation3 + $0xa0] sm:$0xf]  ;;  %v2344_v24 = vld [vmem:[#allocation3 + $0xac] sm:$0xf0]  ;;  %v2037_v25 = vor.u32 %v2444_v22, %v2036_v20  ;;  %1232 = vmatpush.bf16.msra.mxu1 %v1781_v17 }
   0xe   :  { %v1764_v26 = vld [vmem:[#allocation3 + $0x1a0] sm:$0xf]  ;;  %v2376_v27 = vld [vmem:[#allocation3 + $0x1ac] sm:$0xf0]  ;;  %v1637_v29 = vor.u32 %v2344_v24, %v1636_v23  ;;  %1245 = vmatpush.bf16.msra.mxu2 %v1909_v21 }
   0xf   :  { %v1892_v28 = vld [vmem:[#allocation3 + $0x2a0] sm:$0xf]  ;;  %v2408_v30 = vld [vmem:[#allocation3 + $0x2ac] sm:$0xf0]  ;;  %v1765_v33 = vor.u32 %v2376_v27, %v1764_v26  ;;  %1258 = vmatpush.bf16.msra.mxu3 %v2037_v25 }
  0x10   :  { %v2020_v31 = vld [vmem:[#allocation3 + $0x3a0] sm:$0xf]  ;;  %v2440_v32 = vld [vmem:[#allocation3 + $0x3ac] sm:$0xf0]  ;;  %v1893_v34 = vor.u32 %v2408_v30, %v1892_v28  ;;  %1220 = vmatpush.bf16.msra.mxu0 %v1637_v29 }
  0x11   :  { %v1620_v35 = vld [vmem:[#allocation3 + $0x80] sm:$0xf]  ;;  %v2340_v36 = vld [vmem:[#allocation3 + $0x8c] sm:$0xf0]  ;;  %v2021_v38 = vor.u32 %v2440_v32, %v2020_v31  ;;  %1233 = vmatpush.bf16.msra.mxu1 %v1765_v33  ;;  %v2350_v33 = vld [vmem:[#allocation3 + $0xe4] sm:$0xf] }
  0x12   :  { %v1748_v37 = vld [vmem:[#allocation3 + $0x180] sm:$0xf]  ;;  %v2372_v39 = vld [vmem:[#allocation3 + $0x18c] sm:$0xf0]  ;;  %v1621_v44 = vor.u32 %v2340_v36, %v1620_v35  ;;  %1246 = vmatpush.bf16.msra.mxu2 %v1893_v34  ;;  %v1670_v34 = vld [vmem:[#allocation3 + $0xf0] sm:$0xf0] }
  0x13   :  { %v1876_v40 = vld [vmem:[#allocation3 + $0x280] sm:$0xf]  ;;  %v2404_v41 = vld [vmem:[#allocation3 + $0x28c] sm:$0xf0]  ;;  %v1749_v45 = vor.u32 %v2372_v39, %v1748_v37  ;;  %1259 = vmatpush.bf16.msra.mxu3 %v2021_v38  ;;  %v2382_v37 = vld [vmem:[#allocation3 + $0x1e4] sm:$0xf] }
  0x14   :  { %v2004_v42 = vld [vmem:[#allocation3 + $0x380] sm:$0xf]  ;;  %v2436_v43 = vld [vmem:[#allocation3 + $0x38c] sm:$0xf0]  ;;  %v1877_v46 = vor.u32 %v2404_v41, %v1876_v40  ;;  %1221 = vmatpush.bf16.msra.mxu0 %v1621_v44  ;;  %v1798_v38 = vld [vmem:[#allocation3 + $0x1f0] sm:$0xf0] }
  0x15   :  { %v1604_v47 = vld [vmem:[#allocation3 + $0x60] sm:$0xf]  ;;  %v2336_v48 = vld [vmem:[#allocation3 + $0x6c] sm:$0xf0]  ;;  %v2005_v50 = vor.u32 %v2436_v43, %v2004_v42  ;;  %1234 = vmatpush.bf16.msra.mxu1 %v1749_v45  ;;  %v1673_v42 = vor.u32 %v2350_v33, %v1670_v34 }
  0x16   :  { %v1732_v49 = vld [vmem:[#allocation3 + $0x160] sm:$0xf]  ;;  %v2368_v51 = vld [vmem:[#allocation3 + $0x16c] sm:$0xf0]  ;;  %v1605_v56 = vor.u32 %v2336_v48, %v1604_v47  ;;  %1247 = vmatpush.bf16.msra.mxu2 %v1877_v46  ;;  %v1801_v46 = vor.u32 %v2382_v37, %v1798_v38  ;;  %v2346_v48 = vld [vmem:[#allocation3 + $0xc4] sm:$0xf] }
  0x17   :  { %v1860_v52 = vld [vmem:[#allocation3 + $0x260] sm:$0xf]  ;;  %v2400_v53 = vld [vmem:[#allocation3 + $0x26c] sm:$0xf0]  ;;  %v1733_v57 = vor.u32 %v2368_v51, %v1732_v49  ;;  %1260 = vmatpush.bf16.msra.mxu3 %v2005_v50  ;;  %v1654_v49 = vld [vmem:[#allocation3 + $0xd0] sm:$0xf0] }
  0x18   :  { %v1988_v54 = vld [vmem:[#allocation3 + $0x360] sm:$0xf]  ;;  %v2432_v55 = vld [vmem:[#allocation3 + $0x36c] sm:$0xf0]  ;;  %v1861_v58 = vor.u32 %v2400_v53, %v1860_v52  ;;  %1222 = vmatpush.bf16.msra.mxu0 %v1605_v56  ;;  %v2378_v50 = vld [vmem:[#allocation3 + $0x1c4] sm:$0xf]  ;;  %v1657_v56 = vor.u32 %v2346_v48, %v1654_v49 }
  0x19   :  { %v1588_v59 = vld [vmem:[#allocation3 + $0x40] sm:$0xf]  ;;  %v2332_v60 = vld [vmem:[#allocation3 + $0x4c] sm:$0xf0]  ;;  %v1989_v62 = vor.u32 %v2432_v55, %v1988_v54  ;;  %1235 = vmatpush.bf16.msra.mxu1 %v1733_v57  ;;  %v1782_v51 = vld [vmem:[#allocation3 + $0x1d0] sm:$0xf0] }
  0x1a   :  { %v1716_v61 = vld [vmem:[#allocation3 + $0x140] sm:$0xf]  ;;  %v2364_v63 = vld [vmem:[#allocation3 + $0x14c] sm:$0xf0]  ;;  %v1589_v4 = vor.u32 %v2332_v60, %v1588_v59  ;;  %1248 = vmatpush.bf16.msra.mxu2 %v1861_v58  ;;  %v2342_v59 = vld [vmem:[#allocation3 + $0xa4] sm:$0xf]  ;;  %v1785_v60 = vor.u32 %v2378_v50, %v1782_v51 }
  0x1b   :  { %v1844_v0 = vld [vmem:[#allocation3 + $0x240] sm:$0xf]  ;;  %v2396_v1 = vld [vmem:[#allocation3 + $0x24c] sm:$0xf0]  ;;  %v1717_v5 = vor.u32 %v2364_v63, %v1716_v61  ;;  %1261 = vmatpush.bf16.msra.mxu3 %v1989_v62  ;;  %v1638_v61 = vld [vmem:[#allocation3 + $0xb0] sm:$0xf0] }
  0x1c   :  { %v1972_v2 = vld [vmem:[#allocation3 + $0x340] sm:$0xf]  ;;  %v2428_v3 = vld [vmem:[#allocation3 + $0x34c] sm:$0xf0]  ;;  %v1845_v6 = vor.u32 %v2396_v1, %v1844_v0  ;;  %1223 = vmatpush.bf16.msra.mxu0 %v1589_v4  ;;  %v2374_v62 = vld [vmem:[#allocation3 + $0x1a4] sm:$0xf] }
  0x1d   :  { %v1572_v7 = vld [vmem:[#allocation3 + $0x20] sm:$0xf]  ;;  %v2328_v8 = vld [vmem:[#allocation3 + $0x2c] sm:$0xf0]  ;;  %v1973_v10 = vor.u32 %v2428_v3, %v1972_v2  ;;  %1236 = vmatpush.bf16.msra.mxu1 %v1717_v5  ;;  %v1766_v63 = vld [vmem:[#allocation3 + $0x1b0] sm:$0xf0] }
  0x1e   :  { %v1700_v9 = vld [vmem:[#allocation3 + $0x120] sm:$0xf]  ;;  %v2360_v11 = vld [vmem:[#allocation3 + $0x12c] sm:$0xf0]  ;;  %v1573_v16 = vor.u32 %v2328_v8, %v1572_v7  ;;  %1249 = vmatpush.bf16.msra.mxu2 %v1845_v6  ;;  %v2338_v5 = vld [vmem:[#allocation3 + $0x84] sm:$0xf] }
  0x1f   :  { %v1828_v12 = vld [vmem:[#allocation3 + $0x220] sm:$0xf]  ;;  %v2392_v13 = vld [vmem:[#allocation3 + $0x22c] sm:$0xf0]  ;;  %v1701_v19 = vor.u32 %v2360_v11, %v1700_v9  ;;  %1262 = vmatpush.bf16.msra.mxu3 %v1973_v10  ;;  %v1622_v6 = vld [vmem:[#allocation3 + $0x90] sm:$0xf0]  ;;  %v1641_v10 = vor.u32 %v2342_v59, %v1638_v61 }
  0x20   :  { %v1956_v14 = vld [vmem:[#allocation3 + $0x320] sm:$0xf]  ;;  %v2424_v15 = vld [vmem:[#allocation3 + $0x32c] sm:$0xf0]  ;;  %v1829_v20 = vor.u32 %v2392_v13, %v1828_v12  ;;  %1224 = vmatpush.bf16.msra.mxu0 %v1573_v16  ;;  %v1606_v37 = vld [vmem:[#allocation3 + $0x70] sm:$0xf0] }
  0x21   :  { %v1556_v17 = vld [vmem:[#allocation3] sm:$0xf]  ;;  %v2324_v18 = vld [vmem:[#allocation3 + $0xc] sm:$0xf0]  ;;  %v1957_v24 = vor.u32 %v2424_v15, %v1956_v14  ;;  %1237 = vmatpush.bf16.msra.mxu1 %v1701_v19  ;;  %v41_v14 = vld [vmem:[%s2653_s0 + $0x18] sm:$0xff]  ;;  %v1769_v15 = vor.u32 %v2374_v62, %v1766_v63 }
  0x22   :  { %v1684_v21 = vld [vmem:[#allocation3 + $0x100] sm:$0xf]  ;;  %v2356_v22 = vld [vmem:[#allocation3 + $0x10c] sm:$0xf0]  ;;  %v1557_v31 = vor.u32 %v2324_v18, %v1556_v17  ;;  %1250 = vmatpush.bf16.msra.mxu2 %v1829_v20  ;;  %v47_v17 = vld [vmem:[%s2654_s1 + $0x18] sm:$0xff] }
  0x23   :  { %v1812_v23 = vld [vmem:[#allocation3 + $0x200] sm:$0xf]  ;;  %v2388_v25 = vld [vmem:[#allocation3 + $0x20c] sm:$0xf0]  ;;  %v1685_v35 = vor.u32 %v2356_v22, %v1684_v21  ;;  %1263 = vmatpush.bf16.msra.mxu3 %v1957_v24  ;;  %v39_v18 = vld [vmem:[%s2653_s0 + $0x8] sm:$0xff] }
  0x24   :  { %v1940_v26 = vld [vmem:[#allocation3 + $0x300] sm:$0xf]  ;;  %v2420_v27 = vld [vmem:[#allocation3 + $0x30c] sm:$0xf0]  ;;  %v1813_v36 = vor.u32 %v2388_v25, %v1812_v23  ;;  %1225 = vmatpush.bf16.msra.mxu0 %v1557_v31  ;;  %v45_v19 = vld [vmem:[%s2654_s1 + $0x8] sm:$0xff]  ;;  %v53_v23 = vsub.f32 %v41_v14, %v47_v17 }
  0x25   :  { %v2180_v28 = vld [vmem:[#allocation3 + $0x4e0] sm:$0xf]  ;;  %v2480_v29 = vld [vmem:[#allocation3 + $0x4ec] sm:$0xf0]  ;;  %v1941_v39 = vor.u32 %v2420_v27, %v1940_v26  ;;  %1238 = vmatpush.bf16.msra.mxu1 %v1685_v35  ;;  %v2370_v20 = vld [vmem:[#allocation3 + $0x184] sm:$0xf]  ;;  %v51_v24 = vsub.f32 %v39_v18, %v45_v19 }
  0x26   :  { %v2308_v30 = vld [vmem:[#allocation3 + $0x5e0] sm:$0xf]  ;;  %v2512_v32 = vld [vmem:[#allocation3 + $0x5ec] sm:$0xf0]  ;;  %v2181_v40 = vor.u32 %v2480_v29, %v2180_v28  ;;  %1251 = vmatpush.bf16.msra.mxu2 %v1813_v36  ;;  %v1750_v21 = vld [vmem:[#allocation3 + $0x190] sm:$0xf0]  ;;  %v1625_v28 = vor.u32 %v2338_v5, %v1622_v6 }
  0x27   :  { %v2309_v41 = vor.u32 %v2512_v32, %v2308_v30  ;;  %v2164_v43 = vld [vmem:[#allocation3 + $0x4c0] sm:$0xf]  ;;  %v2476_v44 = vld [vmem:[#allocation3 + $0x4cc] sm:$0xf0]  ;;  %1264 = vmatpush.bf16.msra.mxu3 %v1941_v39  ;;  %v2597_v32 = vpack.c.bf16 %v53_v23, %v53_v23  ;;  %v2599_v33 = vpack.c.bf16 %v51_v24, %v51_v24  ;;  %v1753_v34 = vor.u32 %v2370_v20, %v1750_v21  ;;  %v2334_v36 = vld [vmem:[#allocation3 + $0x64] sm:$0xf] }
  0x28   :  { %v2292_v45 = vld [vmem:[#allocation3 + $0x5c0] sm:$0xf]  ;;  %v2508_v47 = vld [vmem:[#allocation3 + $0x5cc] sm:$0xf0]  ;;  %1270 = vmatpush.bf16.msrb.mxu0 %v2181_v40  ;;  %v2165_v52 = vor.u32 %v2476_v44, %v2164_v43  ;;  %v2366_v38 = vld [vmem:[#allocation3 + $0x164] sm:$0xf] }
  0x29   :  { %v2148_v53 = vld [vmem:[#allocation3 + $0x4a0] sm:$0xf]  ;;  %v2472_v54 = vld [vmem:[#allocation3 + $0x4ac] sm:$0xf0]  ;;  %1283 = vmatpush.bf16.msrb.mxu1 %v2309_v41  ;;  %v2293_v55 = vor.u32 %v2508_v47, %v2292_v45  ;;  %v1734_v39 = vld [vmem:[#allocation3 + $0x170] sm:$0xf0] }
  0x2a   :  { %1296 = vmatpush.bf16.msrb.mxu2 %v1673_v42  ;;  %v2276_v57 = vld [vmem:[#allocation3 + $0x5a0] sm:$0xf]  ;;  %v2504_v58 = vld [vmem:[#allocation3 + $0x5ac] sm:$0xf0]  ;;  %v2149_v4 = vor.u32 %v2472_v54, %v2148_v53  ;;  %1265 = vmatmul.bf16.vlgmr.msra.gmra.mxu3 %v2597_v32  ;;  %v1609_v42 = vor.u32 %v2334_v36, %v1606_v37  ;;  %v2330_v48 = vld [vmem:[#allocation3 + $0x44] sm:$0xf] }
  0x2b   :  { %1309 = vmatpush.bf16.msrb.mxu3 %v1801_v46  ;;  %v2132_v0 = vld [vmem:[#allocation3 + $0x480] sm:$0xf]  ;;  %v2468_v1 = vld [vmem:[#allocation3 + $0x48c] sm:$0xf0]  ;;  %v2277_v9 = vor.u32 %v2504_v58, %v2276_v57  ;;  %1239 = vmatmul.bf16.vlgmr.msra.gmra.mxu1 %v2599_v33  ;;  %v1737_v46 = vor.u32 %v2366_v38, %v1734_v39  ;;  %v1590_v49 = vld [vmem:[#allocation3 + $0x50] sm:$0xf0] }
  0x2c   :  { %v2260_v2 = vld [vmem:[#allocation3 + $0x580] sm:$0xf]  ;;  %v2500_v3 = vld [vmem:[#allocation3 + $0x58c] sm:$0xf0]  ;;  %1271 = vmatpush.bf16.msrb.mxu0 %v2165_v52  ;;  %v2133_v25 = vor.u32 %v2468_v1, %v2132_v0  ;;  %v2362_v50 = vld [vmem:[#allocation3 + $0x144] sm:$0xf] }
  0x2d   :  { %v38_v7 = vld [vmem:[%s2653_s0] sm:$0xff]  ;;  %1284 = vmatpush.bf16.msrb.mxu1 %v2293_v55  ;;  %v40_v12 = vld [vmem:[%s2653_s0 + $0x10] sm:$0xff]  ;;  %v2261_v26 = vor.u32 %v2500_v3, %v2260_v2  ;;  %v1593_v55 = vor.u32 %v2330_v48, %v1590_v49  ;;  %v43_v14 = vld [vmem:[%s2653_s0 + $0x28] sm:$0xff] }
  0x2e   :  { %v44_v8 = vld [vmem:[%s2654_s1] sm:$0xff]  ;;  %1297 = vmatpush.bf16.msrb.mxu2 %v1657_v56  ;;  %v46_v13 = vld [vmem:[%s2654_s1 + $0x10] sm:$0xff] }
  0x2f   :  { %v50_v11 = vsub.f32 %v38_v7, %v44_v8  ;;  %1310 = vmatpush.bf16.msrb.mxu3 %v1785_v60  ;;  %v52_v16 = vsub.f32 %v40_v12, %v46_v13  ;;  %v2116_v29 = vld [vmem:[#allocation3 + $0x460] sm:$0xf]  ;;  %v2464_v30 = vld [vmem:[#allocation3 + $0x46c] sm:$0xf0]  ;;  %v1718_v51 = vld [vmem:[#allocation3 + $0x150] sm:$0xf0] }
  0x30   :  { %1272 = vmatpush.bf16.msrb.mxu0 %v2149_v4  ;;  %v2244_v31 = vld [vmem:[#allocation3 + $0x560] sm:$0xf]  ;;  %v2496_v35 = vld [vmem:[#allocation3 + $0x56c] sm:$0xf0]  ;;  %v2117_v40 = vor.u32 %v2464_v30, %v2116_v29  ;;  %v1721_v59 = vor.u32 %v2362_v50, %v1718_v51  ;;  %v2326_v60 = vld [vmem:[#allocation3 + $0x24] sm:$0xf] }
  0x31   :  { %v2593_v22 = vpack.c.bf16 %v50_v11, %v50_v11  ;;  %v2595_v27 = vpack.c.bf16 %v52_v16, %v52_v16  ;;  %1285 = vmatpush.bf16.msrb.mxu1 %v2277_v9  ;;  %v2245_v41 = vor.u32 %v2496_v35, %v2244_v31  ;;  %v2100_v43 = vld [vmem:[#allocation3 + $0x440] sm:$0xf]  ;;  %v2460_v44 = vld [vmem:[#allocation3 + $0x44c] sm:$0xf0]  ;;  %v1574_v61 = vld [vmem:[#allocation3 + $0x30] sm:$0xf0] }
  0x32   :  { %1298 = vmatpush.bf16.msrb.mxu2 %v1641_v10  ;;  %v2228_v45 = vld [vmem:[#allocation3 + $0x540] sm:$0xf]  ;;  %v2492_v47 = vld [vmem:[#allocation3 + $0x54c] sm:$0xf0]  ;;  %v2101_v52 = vor.u32 %v2460_v44, %v2100_v43  ;;  %v2358_v62 = vld [vmem:[#allocation3 + $0x124] sm:$0xf]  ;;  %v1577_v8 = vor.u32 %v2326_v60, %v1574_v61 }
  0x33   :  { %1311 = vmatpush.bf16.msrb.mxu3 %v1769_v15  ;;  %1226 = vmatmul.bf16.vlgmr.msra.gmra.mxu0 %v2593_v22  ;;  %v2084_v53 = vld [vmem:[#allocation3 + $0x420] sm:$0xf]  ;;  %v2229_v54 = vor.u32 %v2492_v47, %v2228_v45  ;;  %v2456_v56 = vld [vmem:[#allocation3 + $0x42c] sm:$0xf0]  ;;  %v1702_v63 = vld [vmem:[#allocation3 + $0x130] sm:$0xf0] }
  0x34   :  { %1252 = vmatmul.bf16.vlgmr.msra.gmra.mxu2 %v2595_v27  ;;  %1273 = vmatpush.bf16.msrb.mxu0 %v2133_v25  ;;  %v2212_v57 = vld [vmem:[#allocation3 + $0x520] sm:$0xf]  ;;  %v2488_v58 = vld [vmem:[#allocation3 + $0x52c] sm:$0xf0]  ;;  %v2085_v2 = vor.u32 %v2456_v56, %v2084_v53  ;;  %v2322_v5 = vld [vmem:[#allocation3 + $0x4] sm:$0xf]  ;;  %v1705_v12 = vor.u32 %v2358_v62, %v1702_v63 }
  0x35   :  { %1286 = vmatpush.bf16.msrb.mxu1 %v2261_v26  ;;  %v2068_v0 = vld [vmem:[#allocation3 + $0x400] sm:$0xf]  ;;  %v2452_v1 = vld [vmem:[#allocation3 + $0x40c] sm:$0xf0]  ;;  %v1558_v6 = vld [vmem:[#allocation3 + $0x10] sm:$0xf0]  ;;  %v2213_v7 = vor.u32 %v2488_v58, %v2212_v57 }
  0x36   :  { %1299 = vmatpush.bf16.msrb.mxu2 %v1625_v28  ;;  %v2196_v3 = vld [vmem:[#allocation3 + $0x500] sm:$0xf]  ;;  %v2484_v4 = vld [vmem:[#allocation3 + $0x50c] sm:$0xf0]  ;;  %v2354_v9 = vld [vmem:[#allocation3 + $0x104] sm:$0xf]  ;;  %v2069_v19 = vor.u32 %v2452_v1, %v2068_v0  ;;  %v1561_v26 = vor.u32 %v2322_v5, %v1558_v6 }
  0x37   :  { %1312 = vmatpush.bf16.msrb.mxu3 %v1753_v34  ;;  %v42_v10 = vld [vmem:[%s2653_s0 + $0x20] sm:$0xff]  ;;  %v1686_v13 = vld [vmem:[#allocation3 + $0x110] sm:$0xf0]  ;;  %v49_v15 = vld [vmem:[%s2654_s1 + $0x28] sm:$0xff]  ;;  %v2197_v25 = vor.u32 %v2484_v4, %v2196_v3 }
  0x38   :  { %1274 = vmatpush.bf16.msrb.mxu0 %v2117_v40  ;;  %v48_v11 = vld [vmem:[%s2654_s1 + $0x20] sm:$0xff]  ;;  %v1926_v17 = vld [vmem:[#allocation3 + $0x2f0] sm:$0xf0]  ;;  %v55_v30 = vsub.f32 %v43_v14, %v49_v15  ;;  %v1689_v31 = vor.u32 %v2354_v9, %v1686_v13 }
  0x39   :  { %1287 = vmatpush.bf16.msrb.mxu1 %v2245_v41  ;;  %v2414_v16 = vld [vmem:[#allocation3 + $0x2e4] sm:$0xf]  ;;  %v2054_v20 = vld [vmem:[#allocation3 + $0x3f0] sm:$0xf0]  ;;  %v54_v24 = vsub.f32 %v42_v10, %v48_v11 }
  0x3a   :  { %1300 = vmatpush.bf16.msrb.mxu2 %v1609_v42  ;;  %v2446_v18 = vld [vmem:[#allocation3 + $0x3e4] sm:$0xf]  ;;  %v2182_v23 = vld [vmem:[#allocation3 + $0x4f0] sm:$0xf0]  ;;  %v1929_v34 = vor.u32 %v2414_v16, %v1926_v17  ;;  %v2619_v47 = vpack.c.bf16 %v55_v30, %v55_v30 }
  0x3b   :  { %1313 = vmatpush.bf16.msrb.mxu3 %v1737_v46  ;;  %v2478_v21 = vld [vmem:[#allocation3 + $0x4e4] sm:$0xf]  ;;  %v2310_v29 = vld [vmem:[#allocation3 + $0x5f0] sm:$0xf0]  ;;  %v2057_v35 = vor.u32 %v2446_v18, %v2054_v20  ;;  %v2617_v44 = vpack.c.bf16 %v54_v24, %v54_v24 }
  0x3c   :  { %1275 = vmatpush.bf16.msrb.mxu0 %v2101_v52  ;;  %v2510_v28 = vld [vmem:[#allocation3 + $0x5e4] sm:$0xf]  ;;  %v2185_v36 = vor.u32 %v2478_v21, %v2182_v23  ;;  %v1910_v38 = vld [vmem:[#allocation3 + $0x2d0] sm:$0xf0] }
  0x3d   :  { %1288 = vmatpush.bf16.msrb.mxu1 %v2229_v54  ;;  %v2410_v37 = vld [vmem:[#allocation3 + $0x2c4] sm:$0xf]  ;;  %v2313_v40 = vor.u32 %v2510_v28, %v2310_v29  ;;  %v2038_v41 = vld [vmem:[#allocation3 + $0x3d0] sm:$0xf0] }
  0x3e   :  { %1301 = vmatpush.bf16.msrb.mxu2 %v1593_v55  ;;  %v2442_v39 = vld [vmem:[#allocation3 + $0x3c4] sm:$0xf]  ;;  %v2166_v43 = vld [vmem:[#allocation3 + $0x4d0] sm:$0xf0]  ;;  %v1913_v48 = vor.u32 %v2410_v37, %v1910_v38 }
  0x3f   :  { %1314 = vmatpush.bf16.msrb.mxu3 %v1721_v59  ;;  %v2474_v42 = vld [vmem:[#allocation3 + $0x4c4] sm:$0xf]  ;;  %v2294_v46 = vld [vmem:[#allocation3 + $0x5d0] sm:$0xf0]  ;;  %v2041_v49 = vor.u32 %v2442_v39, %v2038_v41 }
  0x40   :  { %1276 = vmatpush.bf16.msrb.mxu0 %v2085_v2  ;;  %v2506_v45 = vld [vmem:[#allocation3 + $0x5c4] sm:$0xf]  ;;  %v2169_v50 = vor.u32 %v2474_v42, %v2166_v43  ;;  %v1894_v52 = vld [vmem:[#allocation3 + $0x2b0] sm:$0xf0] }
  0x41   :  { %1289 = vmatpush.bf16.msrb.mxu1 %v2213_v7  ;;  %v2406_v51 = vld [vmem:[#allocation3 + $0x2a4] sm:$0xf]  ;;  %v2297_v54 = vor.u32 %v2506_v45, %v2294_v46  ;;  %v2022_v55 = vld [vmem:[#allocation3 + $0x3b0] sm:$0xf0] }
  0x42   :  { %1302 = vmatpush.bf16.msrb.mxu2 %v1577_v8  ;;  %v2438_v53 = vld [vmem:[#allocation3 + $0x3a4] sm:$0xf]  ;;  %v2150_v57 = vld [vmem:[#allocation3 + $0x4b0] sm:$0xf0]  ;;  %v1897_v60 = vor.u32 %v2406_v51, %v1894_v52 }
  0x43   :  { %1315 = vmatpush.bf16.msrb.mxu3 %v1705_v12  ;;  %v2470_v56 = vld [vmem:[#allocation3 + $0x4a4] sm:$0xf]  ;;  %v2278_v59 = vld [vmem:[#allocation3 + $0x5b0] sm:$0xf0]  ;;  %v2025_v61 = vor.u32 %v2438_v53, %v2022_v55 }
  0x44   :  { %1277 = vmatpush.bf16.msrb.mxu0 %v2069_v19  ;;  %v2502_v58 = vld [vmem:[#allocation3 + $0x5a4] sm:$0xf]  ;;  %v2153_v62 = vor.u32 %v2470_v56, %v2150_v57  ;;  %v1878_v0 = vld [vmem:[#allocation3 + $0x290] sm:$0xf0] }
  0x45   :  { %1290 = vmatpush.bf16.msrb.mxu1 %v2197_v25  ;;  %v2402_v63 = vld [vmem:[#allocation3 + $0x284] sm:$0xf]  ;;  %v2281_v2 = vor.u32 %v2502_v58, %v2278_v59  ;;  %v2006_v3 = vld [vmem:[#allocation3 + $0x390] sm:$0xf0] }
  0x46   :  { %1303 = vmatpush.bf16.msrb.mxu2 %v1561_v26  ;;  %v2434_v1 = vld [vmem:[#allocation3 + $0x384] sm:$0xf]  ;;  %v2134_v5 = vld [vmem:[#allocation3 + $0x490] sm:$0xf0]  ;;  %v1881_v8 = vor.u32 %v2402_v63, %v1878_v0  ;;  %v2353_v63 = vld [vmem:[#allocation3 + $0xf4] sm:$0xf0] }
  0x47   :  { %1316 = vmatpush.bf16.msrb.mxu3 %v1689_v31  ;;  %1278 = vmatmul.bf16.vlgmr.msrb.gmra.mxu0 %v2617_v44  ;;  %v2466_v4 = vld [vmem:[#allocation3 + $0x484] sm:$0xf]  ;;  %v2262_v7 = vld [vmem:[#allocation3 + $0x590] sm:$0xf0]  ;;  %v2009_v9 = vor.u32 %v2434_v1, %v2006_v3  ;;  %v1804_v0 = vld [vmem:[#allocation3 + $0x1e8] sm:$0xf] }
  0x48   :  { %1322 = vmatpush.bf16.msra.mxu0 %v1929_v34  ;;  %1291 = vmatmul.bf16.vlgmr.msrb.gmra.mxu1 %v2619_v47  ;;  %v2498_v6 = vld [vmem:[#allocation3 + $0x584] sm:$0xf]  ;;  %v2137_v10 = vor.u32 %v2466_v4, %v2134_v5  ;;  %v1862_v12 = vld [vmem:[#allocation3 + $0x270] sm:$0xf0]  ;;  %v1932_v3 = vld [vmem:[#allocation3 + $0x2e8] sm:$0xf] }
  0x49   :  { %1335 = vmatpush.bf16.msra.mxu1 %v2057_v35  ;;  %1304 = vmatmul.bf16.vlgmr.msrb.gmra.mxu2 %v2593_v22  ;;  %v2398_v11 = vld [vmem:[#allocation3 + $0x264] sm:$0xf]  ;;  %v2265_v14 = vor.u32 %v2498_v6, %v2262_v7  ;;  %v1990_v15 = vld [vmem:[#allocation3 + $0x370] sm:$0xf0]  ;;  %v2417_v4 = vld [vmem:[#allocation3 + $0x2f4] sm:$0xf0] }
  0x4a   :  { %1348 = vmatpush.bf16.msra.mxu2 %v2185_v36  ;;  %1317 = vmatmul.bf16.vlgmr.msrb.gmra.mxu3 %v2599_v33  ;;  %v2430_v13 = vld [vmem:[#allocation3 + $0x364] sm:$0xf]  ;;  %v2118_v17 = vld [vmem:[#allocation3 + $0x470] sm:$0xf0]  ;;  %v1865_v20 = vor.u32 %v2398_v11, %v1862_v12  ;;  %v2060_v7 = vld [vmem:[#allocation3 + $0x3e8] sm:$0xf]  ;;  %v1933_v12 = vor.u32 %v2417_v4, %v1932_v3 }
  0x4b   :  { %1361 = vmatpush.bf16.msra.mxu3 %v2313_v40  ;;  %v2462_v16 = vld [vmem:[#allocation3 + $0x464] sm:$0xf]  ;;  %v2246_v19 = vld [vmem:[#allocation3 + $0x570] sm:$0xf0]  ;;  %v1993_v21 = vor.u32 %v2430_v13, %v1990_v15  ;;  %v1660_v13 = vld [vmem:[#allocation3 + $0xc8] sm:$0xf] }
  0x4c   :  { %1323 = vmatpush.bf16.msra.mxu0 %v1913_v48  ;;  %v2494_v18 = vld [vmem:[#allocation3 + $0x564] sm:$0xf]  ;;  %v2121_v23 = vor.u32 %v2462_v16, %v2118_v17  ;;  %v1846_v25 = vld [vmem:[#allocation3 + $0x250] sm:$0xf0]  ;;  %v1788_v15 = vld [vmem:[#allocation3 + $0x1c8] sm:$0xf] }
  0x4d   :  { %1336 = vmatpush.bf16.msra.mxu1 %v2041_v49  ;;  %v2394_v24 = vld [vmem:[#allocation3 + $0x244] sm:$0xf]  ;;  %v2249_v28 = vor.u32 %v2494_v18, %v2246_v19  ;;  %v1974_v29 = vld [vmem:[#allocation3 + $0x350] sm:$0xf0]  ;;  %v2381_v17 = vld [vmem:[#allocation3 + $0x1d4] sm:$0xf0] }
  0x4e   :  { %1349 = vmatpush.bf16.msra.mxu2 %v2169_v50  ;;  %v2426_v26 = vld [vmem:[#allocation3 + $0x344] sm:$0xf]  ;;  %v2102_v31 = vld [vmem:[#allocation3 + $0x450] sm:$0xf0]  ;;  %v1849_v36 = vor.u32 %v2394_v24, %v1846_v25  ;;  %v1916_v18 = vld [vmem:[#allocation3 + $0x2c8] sm:$0xf]  ;;  %v1789_v24 = vor.u32 %v2381_v17, %v1788_v15 }
  0x4f   :  { %1362 = vmatpush.bf16.msra.mxu3 %v2297_v54  ;;  %v2458_v30 = vld [vmem:[#allocation3 + $0x444] sm:$0xf]  ;;  %v2230_v35 = vld [vmem:[#allocation3 + $0x550] sm:$0xf0]  ;;  %v1977_v37 = vor.u32 %v2426_v26, %v1974_v29  ;;  %v2413_v19 = vld [vmem:[#allocation3 + $0x2d4] sm:$0xf0] }
  0x50   :  { %1324 = vmatpush.bf16.msra.mxu0 %v1897_v60  ;;  %v2490_v34 = vld [vmem:[#allocation3 + $0x544] sm:$0xf]  ;;  %v2105_v38 = vor.u32 %v2458_v30, %v2102_v31  ;;  %v1830_v40 = vld [vmem:[#allocation3 + $0x230] sm:$0xf0]  ;;  %v1917_v25 = vor.u32 %v2413_v19, %v1916_v18  ;;  %v1644_v26 = vld [vmem:[#allocation3 + $0xa8] sm:$0xf] }
  0x51   :  { %1337 = vmatpush.bf16.msra.mxu1 %v2025_v61  ;;  %v2390_v39 = vld [vmem:[#allocation3 + $0x224] sm:$0xf]  ;;  %v2233_v42 = vor.u32 %v2490_v34, %v2230_v35  ;;  %v1958_v43 = vld [vmem:[#allocation3 + $0x330] sm:$0xf0]  ;;  %v1772_v29 = vld [vmem:[#allocation3 + $0x1a8] sm:$0xf] }
  0x52   :  { %1350 = vmatpush.bf16.msra.mxu2 %v2153_v62  ;;  %v2422_v41 = vld [vmem:[#allocation3 + $0x324] sm:$0xf]  ;;  %v2086_v46 = vld [vmem:[#allocation3 + $0x430] sm:$0xf0]  ;;  %v1833_v50 = vor.u32 %v2390_v39, %v1830_v40  ;;  %v1676_v62 = vld [vmem:[#allocation3 + $0xe8] sm:$0xf] }
  0x53   :  { %1363 = vmatpush.bf16.msra.mxu3 %v2281_v2  ;;  %v2454_v45 = vld [vmem:[#allocation3 + $0x424] sm:$0xf]  ;;  %v2214_v49 = vld [vmem:[#allocation3 + $0x530] sm:$0xf0]  ;;  %v1961_v53 = vor.u32 %v2422_v41, %v1958_v43  ;;  %v2385_v2 = vld [vmem:[#allocation3 + $0x1f4] sm:$0xf0] }
  0x54   :  { %1325 = vmatpush.bf16.msra.mxu0 %v1881_v8  ;;  %v2486_v48 = vld [vmem:[#allocation3 + $0x524] sm:$0xf]  ;;  %v1814_v52 = vld [vmem:[#allocation3 + $0x210] sm:$0xf0]  ;;  %v2089_v54 = vor.u32 %v2454_v45, %v2086_v46  ;;  %v2449_v8 = vld [vmem:[#allocation3 + $0x3f4] sm:$0xf0]  ;;  %v1805_v11 = vor.u32 %v2385_v2, %v1804_v0 }
  0x55   :  { %1338 = vmatpush.bf16.msra.mxu1 %v2009_v9  ;;  %v2386_v51 = vld [vmem:[#allocation3 + $0x204] sm:$0xf]  ;;  %v1942_v56 = vld [vmem:[#allocation3 + $0x310] sm:$0xf0]  ;;  %v2217_v58 = vor.u32 %v2486_v48, %v2214_v49  ;;  %v2061_v16 = vor.u32 %v2449_v8, %v2060_v7  ;;  %v2377_v31 = vld [vmem:[#allocation3 + $0x1b4] sm:$0xf0] }
  0x56   :  { %1351 = vmatpush.bf16.msra.mxu2 %v2137_v10  ;;  %v2418_v55 = vld [vmem:[#allocation3 + $0x304] sm:$0xf]  ;;  %v2070_v59 = vld [vmem:[#allocation3 + $0x410] sm:$0xf0]  ;;  %v1817_v1 = vor.u32 %v2386_v51, %v1814_v52  ;;  %v1677_v10 = vor.u32 %v2353_v63, %v1676_v62  ;;  %v1900_v34 = vld [vmem:[#allocation3 + $0x2a8] sm:$0xf]  ;;  %v1773_v39 = vor.u32 %v2377_v31, %v1772_v29 }
  0x57   :  { %1364 = vmatpush.bf16.msra.mxu3 %v2265_v14  ;;  %v2450_v57 = vld [vmem:[#allocation3 + $0x404] sm:$0xf]  ;;  %v2198_v61 = vld [vmem:[#allocation3 + $0x510] sm:$0xf0]  ;;  %v1945_v5 = vor.u32 %v2418_v55, %v1942_v56  ;;  %v2349_v14 = vld [vmem:[#allocation3 + $0xd4] sm:$0xf0] }
  0x58   :  { %1326 = vmatpush.bf16.msra.mxu0 %v1865_v20  ;;  %v2482_v60 = vld [vmem:[#allocation3 + $0x504] sm:$0xf]  ;;  %v2073_v6 = vor.u32 %v2450_v57, %v2070_v59  ;;  %v2044_v20 = vld [vmem:[#allocation3 + $0x3c8] sm:$0xf]  ;;  %v2409_v35 = vld [vmem:[#allocation3 + $0x2b4] sm:$0xf0] }
  0x59   :  { %1339 = vmatpush.bf16.msra.mxu1 %v1993_v21  ;;  %v2201_v9 = vor.u32 %v2482_v60, %v2198_v61  ;;  %v2445_v21 = vld [vmem:[#allocation3 + $0x3d4] sm:$0xf0]  ;;  %v1901_v40 = vor.u32 %v2409_v35, %v1900_v34  ;;  %v1628_v41 = vld [vmem:[#allocation3 + $0x88] sm:$0xf] }
  0x5a   :  { %1352 = vmatpush.bf16.msra.mxu2 %v2121_v23  ;;  %v1661_v23 = vor.u32 %v2349_v14, %v1660_v13  ;;  %v2045_v30 = vor.u32 %v2445_v21, %v2044_v20  ;;  %v1756_v43 = vld [vmem:[#allocation3 + $0x188] sm:$0xf]  ;;  %v2373_v46 = vld [vmem:[#allocation3 + $0x194] sm:$0xf0] }
  0x5b   :  { %1365 = vmatpush.bf16.msra.mxu3 %v2249_v28  ;;  %v2345_v28 = vld [vmem:[#allocation3 + $0xb4] sm:$0xf0]  ;;  %v1884_v48 = vld [vmem:[#allocation3 + $0x288] sm:$0xf] }
  0x5c   :  { %1327 = vmatpush.bf16.msra.mxu0 %v1849_v36  ;;  %v2028_v36 = vld [vmem:[#allocation3 + $0x3a8] sm:$0xf]  ;;  %v2405_v49 = vld [vmem:[#allocation3 + $0x294] sm:$0xf0] }
  0x5d   :  { %1340 = vmatpush.bf16.msra.mxu1 %v1977_v37  ;;  %v2441_v37 = vld [vmem:[#allocation3 + $0x3b4] sm:$0xf0]  ;;  %v1612_v55 = vld [vmem:[#allocation3 + $0x68] sm:$0xf] }
  0x5e   :  { %1353 = vmatpush.bf16.msra.mxu2 %v2105_v38  ;;  %v1645_v38 = vor.u32 %v2345_v28, %v1644_v26  ;;  %v2029_v45 = vor.u32 %v2441_v37, %v2028_v36  ;;  %v2437_v51 = vld [vmem:[#allocation3 + $0x394] sm:$0xf0]  ;;  %v1740_v57 = vld [vmem:[#allocation3 + $0x168] sm:$0xf] }
  0x5f   :  { %1366 = vmatpush.bf16.msra.mxu3 %v2233_v42  ;;  %v2341_v42 = vld [vmem:[#allocation3 + $0x94] sm:$0xf0]  ;;  %v1868_v60 = vld [vmem:[#allocation3 + $0x268] sm:$0xf] }
  0x60   :  { %1328 = vmatpush.bf16.msra.mxu0 %v1833_v50  ;;  %v2012_v50 = vld [vmem:[#allocation3 + $0x388] sm:$0xf]  ;;  %v1629_v52 = vor.u32 %v2341_v42, %v1628_v41  ;;  %v2337_v56 = vld [vmem:[#allocation3 + $0x74] sm:$0xf0] }
  0x61   :  { %1341 = vmatpush.bf16.msra.mxu1 %v1961_v53  ;;  %v1757_v53 = vor.u32 %v2373_v46, %v1756_v43  ;;  %v2369_v59 = vld [vmem:[#allocation3 + $0x174] sm:$0xf0]  ;;  %v1996_v62 = vld [vmem:[#allocation3 + $0x368] sm:$0xf]  ;;  %v1613_v0 = vor.u32 %v2337_v56, %v1612_v55  ;;  %v2351_v46 = vld [vmem:[#allocation3 + $0xec] sm:$0xf] }
  0x62   :  { %1354 = vmatpush.bf16.msra.mxu2 %v2089_v54  ;;  %v1885_v54 = vor.u32 %v2405_v49, %v1884_v48  ;;  %v2401_v61 = vld [vmem:[#allocation3 + $0x274] sm:$0xf0]  ;;  %v1596_v3 = vld [vmem:[#allocation3 + $0x48] sm:$0xf]  ;;  %v1678_v48 = vld [vmem:[#allocation3 + $0xf8] sm:$0xf0] }
  0x63   :  { %1367 = vmatpush.bf16.msra.mxu3 %v2217_v58  ;;  %v2013_v58 = vor.u32 %v2437_v51, %v2012_v50  ;;  %v2433_v63 = vld [vmem:[#allocation3 + $0x374] sm:$0xf0]  ;;  %v1869_v2 = vor.u32 %v2401_v61, %v1868_v60  ;;  %v1852_v8 = vld [vmem:[#allocation3 + $0x248] sm:$0xf]  ;;  %v2383_v51 = vld [vmem:[#allocation3 + $0x1ec] sm:$0xf]  ;;  %v1681_v56 = vor.u32 %v2351_v46, %v1678_v48 }
  0x64   :  { %1329 = vmatpush.bf16.msra.mxu0 %v1817_v1  ;;  %v1741_v1 = vor.u32 %v2369_v59, %v1740_v57  ;;  %v2333_v4 = vld [vmem:[#allocation3 + $0x54] sm:$0xf0]  ;;  %v1580_v15 = vld [vmem:[#allocation3 + $0x28] sm:$0xf] }
  0x65   :  { %1342 = vmatpush.bf16.msra.mxu1 %v1945_v5  ;;  %v1724_v5 = vld [vmem:[#allocation3 + $0x148] sm:$0xf]  ;;  %v2365_v7 = vld [vmem:[#allocation3 + $0x154] sm:$0xf0] }
  0x66   :  { %1355 = vmatpush.bf16.msra.mxu2 %v2073_v6  ;;  %v1997_v6 = vor.u32 %v2433_v63, %v1996_v62  ;;  %v1725_v13 = vor.u32 %v2365_v7, %v1724_v5  ;;  %v1708_v17 = vld [vmem:[#allocation3 + $0x128] sm:$0xf]  ;;  %v2361_v19 = vld [vmem:[#allocation3 + $0x134] sm:$0xf0]  ;;  %v2347_v62 = vld [vmem:[#allocation3 + $0xcc] sm:$0xf] }
  0x67   :  { %1368 = vmatpush.bf16.msra.mxu3 %v2201_v9  ;;  %1330 = vmatmul.bf16.vlgmr.msra.gmra.mxu0 %v2595_v27  ;;  %v2397_v9 = vld [vmem:[#allocation3 + $0x254] sm:$0xf0]  ;;  %v1836_v20 = vld [vmem:[#allocation3 + $0x228] sm:$0xf]  ;;  %v1709_v29 = vor.u32 %v2361_v19, %v1708_v17  ;;  %v1662_v63 = vld [vmem:[#allocation3 + $0xd8] sm:$0xf0] }
  0x68   :  { %1374 = vmatpush.bf16.msrb.mxu0 %v1677_v10  ;;  %1343 = vmatmul.bf16.vlgmr.msra.gmra.mxu1 %v2597_v32  ;;  %v1980_v10 = vld [vmem:[#allocation3 + $0x348] sm:$0xf]  ;;  %v1853_v14 = vor.u32 %v2397_v9, %v1852_v8  ;;  %v2393_v21 = vld [vmem:[#allocation3 + $0x234] sm:$0xf0] }
  0x69   :  { %1387 = vmatpush.bf16.msrb.mxu1 %v1805_v11  ;;  %1356 = vmatmul.bf16.vlgmr.msra.gmra.mxu2 %v2617_v44  ;;  %v2429_v11 = vld [vmem:[#allocation3 + $0x354] sm:$0xf0]  ;;  %v1564_v26 = vld [vmem:[#allocation3 + $0x8] sm:$0xf] }
  0x6a   :  { %1400 = vmatpush.bf16.msrb.mxu2 %v1933_v12  ;;  %1369 = vmatmul.bf16.vlgmr.msra.gmra.mxu3 %v2619_v47  ;;  %v1597_v12 = vor.u32 %v2333_v4, %v1596_v3  ;;  %v1981_v18 = vor.u32 %v2429_v11, %v1980_v10  ;;  %v2325_v28 = vld [vmem:[#allocation3 + $0x14] sm:$0xf0]  ;;  %v1692_v31 = vld [vmem:[#allocation3 + $0x108] sm:$0xf]  ;;  %v1665_v4 = vor.u32 %v2347_v62, %v1662_v63  ;;  %v2343_v10 = vld [vmem:[#allocation3 + $0xac] sm:$0xf] }
  0x6b   :  { %1413 = vmatpush.bf16.msrb.mxu3 %v2061_v16  ;;  %v2329_v16 = vld [vmem:[#allocation3 + $0x34] sm:$0xf0]  ;;  %v1820_v35 = vld [vmem:[#allocation3 + $0x208] sm:$0xf]  ;;  %v1565_v43 = vor.u32 %v2325_v28, %v1564_v26  ;;  %v1646_v11 = vld [vmem:[#allocation3 + $0xb8] sm:$0xf0] }
  0x6c   :  { %1375 = vmatpush.bf16.msrb.mxu0 %v1661_v23  ;;  %v1964_v23 = vld [vmem:[#allocation3 + $0x328] sm:$0xf]  ;;  %v2357_v34 = vld [vmem:[#allocation3 + $0x114] sm:$0xf0]  ;;  %v1758_v26 = vld [vmem:[#allocation3 + $0x198] sm:$0xf0] }
  0x6d   :  { %1388 = vmatpush.bf16.msrb.mxu1 %v1789_v24  ;;  %v2425_v24 = vld [vmem:[#allocation3 + $0x334] sm:$0xf0]  ;;  %v2316_v42 = vld [vmem:[#allocation3 + $0x5e8] sm:$0xf]  ;;  %v1693_v49 = vor.u32 %v2357_v34, %v1692_v31 }
  0x6e   :  { %1401 = vmatpush.bf16.msrb.mxu2 %v1917_v25  ;;  %v1581_v25 = vor.u32 %v2329_v16, %v1580_v15  ;;  %v1965_v36 = vor.u32 %v2425_v24, %v1964_v23  ;;  %v2389_v37 = vld [vmem:[#allocation3 + $0x214] sm:$0xf0]  ;;  %v2172_v57 = vld [vmem:[#allocation3 + $0x4c8] sm:$0xf]  ;;  %v1649_v16 = vor.u32 %v2343_v10, %v1646_v11  ;;  %v2339_v23 = vld [vmem:[#allocation3 + $0x8c] sm:$0xf] }
  0x6f   :  { %1414 = vmatpush.bf16.msrb.mxu3 %v2045_v30  ;;  %v1837_v30 = vor.u32 %v2393_v21, %v1836_v20  ;;  %v2481_v41 = vld [vmem:[#allocation3 + $0x4f4] sm:$0xf0]  ;;  %v1821_v50 = vor.u32 %v2389_v37, %v1820_v35  ;;  %v2300_v59 = vld [vmem:[#allocation3 + $0x5c8] sm:$0xf]  ;;  %v1630_v24 = vld [vmem:[#allocation3 + $0x98] sm:$0xf0] }
  0x70   :  { %1376 = vmatpush.bf16.msrb.mxu0 %v1645_v38  ;;  %v1948_v38 = vld [vmem:[#allocation3 + $0x308] sm:$0xf]  ;;  %v2509_v61 = vld [vmem:[#allocation3 + $0x5d4] sm:$0xf0]  ;;  %v2323_v11 = vld [vmem:[#allocation3 + $0xc] sm:$0xf] }
  0x71   :  { %1389 = vmatpush.bf16.msrb.mxu1 %v1773_v39  ;;  %v2421_v39 = vld [vmem:[#allocation3 + $0x314] sm:$0xf0]  ;;  %v2301_v3 = vor.u32 %v2509_v61, %v2300_v59  ;;  %v2156_v5 = vld [vmem:[#allocation3 + $0x4a8] sm:$0xf] }
  0x72   :  { %1402 = vmatpush.bf16.msrb.mxu2 %v1901_v40  ;;  %v2188_v40 = vld [vmem:[#allocation3 + $0x4e8] sm:$0xf]  ;;  %v2505_v9 = vld [vmem:[#allocation3 + $0x5b4] sm:$0xf0] }
  0x73   :  { %1415 = vmatpush.bf16.msrb.mxu3 %v2029_v45  ;;  %v2513_v45 = vld [vmem:[#allocation3 + $0x5f4] sm:$0xf0]  ;;  %v2284_v7 = vld [vmem:[#allocation3 + $0x5a8] sm:$0xf] }
  0x74   :  { %1377 = vmatpush.bf16.msrb.mxu0 %v1629_v52  ;;  %v1806_v52 = vld [vmem:[#allocation3 + $0x1f8] sm:$0xf0]  ;;  %v2317_v55 = vor.u32 %v2513_v45, %v2316_v42  ;;  %v2285_v15 = vor.u32 %v2505_v9, %v2284_v7  ;;  %v2140_v17 = vld [vmem:[#allocation3 + $0x488] sm:$0xf]  ;;  %v2501_v21 = vld [vmem:[#allocation3 + $0x594] sm:$0xf0] }
  0x75   :  { %1390 = vmatpush.bf16.msrb.mxu1 %v1757_v53  ;;  %v1949_v53 = vor.u32 %v2421_v39, %v1948_v38  ;;  %v1809_v60 = vor.u32 %v2383_v51, %v1806_v52  ;;  %v2268_v19 = vld [vmem:[#allocation3 + $0x588] sm:$0xf]  ;;  %v2465_v34 = vld [vmem:[#allocation3 + $0x474] sm:$0xf0]  ;;  %v2335_v38 = vld [vmem:[#allocation3 + $0x6c] sm:$0xf] }
  0x76   :  { %1403 = vmatpush.bf16.msrb.mxu2 %v1885_v54  ;;  %v2189_v54 = vor.u32 %v2481_v41, %v2188_v40  ;;  %v2124_v31 = vld [vmem:[#allocation3 + $0x468] sm:$0xf]  ;;  %v2497_v37 = vld [vmem:[#allocation3 + $0x574] sm:$0xf0]  ;;  %v1614_v39 = vld [vmem:[#allocation3 + $0x78] sm:$0xf0] }
  0x77   :  { %1416 = vmatpush.bf16.msrb.mxu3 %v2013_v58  ;;  %v2477_v58 = vld [vmem:[#allocation3 + $0x4d4] sm:$0xf0]  ;;  %v2252_v35 = vld [vmem:[#allocation3 + $0x568] sm:$0xf]  ;;  %v2367_v40 = vld [vmem:[#allocation3 + $0x16c] sm:$0xf]  ;;  %v2125_v42 = vor.u32 %v2465_v34, %v2124_v31  ;;  %v1617_v45 = vor.u32 %v2335_v38, %v1614_v39 }
  0x78   :  { %1378 = vmatpush.bf16.msrb.mxu0 %v1613_v0  ;;  %v2379_v0 = vld [vmem:[#allocation3 + $0x1cc] sm:$0xf]  ;;  %v1742_v41 = vld [vmem:[#allocation3 + $0x178] sm:$0xf0]  ;;  %v2108_v46 = vld [vmem:[#allocation3 + $0x448] sm:$0xf] }
  0x79   :  { %1391 = vmatpush.bf16.msrb.mxu1 %v1741_v1  ;;  %v1790_v1 = vld [vmem:[#allocation3 + $0x1d8] sm:$0xf0]  ;;  %v2461_v48 = vld [vmem:[#allocation3 + $0x454] sm:$0xf0]  ;;  %v2331_v52 = vld [vmem:[#allocation3 + $0x4c] sm:$0xf] }
  0x7a   :  { %1404 = vmatpush.bf16.msrb.mxu2 %v1869_v2  ;;  %v2173_v2 = vor.u32 %v2477_v58, %v2172_v57  ;;  %v1793_v8 = vor.u32 %v2379_v0, %v1790_v1  ;;  %v2493_v51 = vld [vmem:[#allocation3 + $0x554] sm:$0xf0]  ;;  %v2092_v59 = vld [vmem:[#allocation3 + $0x428] sm:$0xf]  ;;  %v2327_v0 = vld [vmem:[#allocation3 + $0x2c] sm:$0xf] }
  0x7b   :  { %1417 = vmatpush.bf16.msrb.mxu3 %v1997_v6  ;;  %v2473_v6 = vld [vmem:[#allocation3 + $0x4b4] sm:$0xf0]  ;;  %v2220_v61 = vld [vmem:[#allocation3 + $0x528] sm:$0xf]  ;;  %v1582_v1 = vld [vmem:[#allocation3 + $0x38] sm:$0xf0] }
  0x7c   :  { %1379 = vmatpush.bf16.msrb.mxu0 %v1597_v12  ;;  %v2375_v12 = vld [vmem:[#allocation3 + $0x1ac] sm:$0xf]  ;;  %v2489_v63 = vld [vmem:[#allocation3 + $0x534] sm:$0xf0]  ;;  %v2204_v9 = vld [vmem:[#allocation3 + $0x508] sm:$0xf] }
  0x7d   :  { %1392 = vmatpush.bf16.msrb.mxu1 %v1725_v13  ;;  %v1774_v13 = vld [vmem:[#allocation3 + $0x1b8] sm:$0xf0]  ;;  %v2221_v7 = vor.u32 %v2489_v63, %v2220_v61  ;;  %v2485_v10 = vld [vmem:[#allocation3 + $0x514] sm:$0xf0]  ;;  %v2403_v61 = vld [vmem:[#allocation3 + $0x28c] sm:$0xf] }
  0x7e   :  { %1405 = vmatpush.bf16.msrb.mxu2 %v1853_v14  ;;  %v2157_v14 = vor.u32 %v2473_v6, %v2156_v5  ;;  %v1777_v20 = vor.u32 %v2375_v12, %v1774_v13  ;;  %v2076_v5 = vld [vmem:[#allocation3 + $0x408] sm:$0xf]  ;;  %v2453_v6 = vld [vmem:[#allocation3 + $0x414] sm:$0xf0]  ;;  %v1566_v13 = vld [vmem:[#allocation3 + $0x18] sm:$0xf0] }
  0x7f   :  { %1418 = vmatpush.bf16.msrb.mxu3 %v1981_v18  ;;  %v2469_v18 = vld [vmem:[#allocation3 + $0x494] sm:$0xf0]  ;;  %v2046_v39 = vld [vmem:[#allocation3 + $0x3d8] sm:$0xf0]  ;;  %v2435_v63 = vld [vmem:[#allocation3 + $0x38c] sm:$0xf] }
  0x80   :  { %1380 = vmatpush.bf16.msrb.mxu0 %v1581_v25  ;;  %v2371_v25 = vld [vmem:[#allocation3 + $0x18c] sm:$0xf]  ;;  %v2141_v28 = vor.u32 %v2469_v18, %v2140_v17  ;;  %v1934_v17 = vld [vmem:[#allocation3 + $0x2f8] sm:$0xf0] }
  0x81   :  { %1393 = vmatpush.bf16.msrb.mxu1 %v1709_v29  ;;  %v2269_v29 = vor.u32 %v2501_v21, %v2268_v19  ;;  %v2447_v18 = vld [vmem:[#allocation3 + $0x3ec] sm:$0xf]  ;;  %v2077_v19 = vor.u32 %v2453_v6, %v2076_v5 }
  0x82   :  { %1406 = vmatpush.bf16.msrb.mxu2 %v1837_v30  ;;  %v1633_v30 = vor.u32 %v2339_v23, %v1630_v24  ;;  %v2479_v21 = vld [vmem:[#allocation3 + $0x4ec] sm:$0xf]  ;;  %v2190_v23 = vld [vmem:[#allocation3 + $0x4f8] sm:$0xf0]  ;;  %v2205_v24 = vor.u32 %v2485_v10, %v2204_v9 }
  0x83   :  { %1419 = vmatpush.bf16.msrb.mxu3 %v1965_v36  ;;  %v1761_v36 = vor.u32 %v2371_v25, %v1758_v26  ;;  %v1569_v25 = vor.u32 %v2323_v11, %v1566_v13  ;;  %v2511_v26 = vld [vmem:[#allocation3 + $0x5ec] sm:$0xf]  ;;  %v2193_v34 = vor.u32 %v2479_v21, %v2190_v23  ;;  %v1998_v11 = vld [vmem:[#allocation3 + $0x378] sm:$0xf0] }
  0x84   :  { %1381 = vmatpush.bf16.msrb.mxu0 %v1565_v43  ;;  %v2253_v43 = vor.u32 %v2497_v37, %v2252_v35  ;;  %v2411_v35 = vld [vmem:[#allocation3 + $0x2cc] sm:$0xf]  ;;  %v2126_v13 = vld [vmem:[#allocation3 + $0x478] sm:$0xf0] }
  0x85   :  { %1394 = vmatpush.bf16.msrb.mxu1 %v1693_v49  ;;  %v2236_v49 = vld [vmem:[#allocation3 + $0x548] sm:$0xf]  ;;  %v2443_v37 = vld [vmem:[#allocation3 + $0x3cc] sm:$0xf] }
  0x86   :  { %1407 = vmatpush.bf16.msrb.mxu2 %v1821_v50  ;;  %v1745_v50 = vor.u32 %v2367_v40, %v1742_v41  ;;  %v2237_v57 = vor.u32 %v2493_v51, %v2236_v49  ;;  %v2475_v40 = vld [vmem:[#allocation3 + $0x4cc] sm:$0xf]  ;;  %v2174_v41 = vld [vmem:[#allocation3 + $0x4d8] sm:$0xf0] }
  0x87   :  { %1420 = vmatpush.bf16.msrb.mxu3 %v1949_v53  ;;  %1382 = vmatmul.bf16.vlgmr.msrb.gmra.mxu0 %v2593_v22  ;;  %v1598_v53 = vld [vmem:[#allocation3 + $0x58] sm:$0xf0]  ;;  %v2407_v49 = vld [vmem:[#allocation3 + $0x2ac] sm:$0xf] }
  0x88   :  { %1426 = vmatpush.bf16.msra.mxu0 %v2189_v54  ;;  %1395 = vmatmul.bf16.vlgmr.msrb.gmra.mxu1 %v2599_v33  ;;  %v2363_v54 = vld [vmem:[#allocation3 + $0x14c] sm:$0xf]  ;;  %v1601_v58 = vor.u32 %v2331_v52, %v1598_v53  ;;  %v2030_v53 = vld [vmem:[#allocation3 + $0x3b8] sm:$0xf0] }
  0x89   :  { %1439 = vmatpush.bf16.msra.mxu1 %v2317_v55  ;;  %1408 = vmatmul.bf16.vlgmr.msrb.gmra.mxu2 %v2595_v27  ;;  %v1726_v55 = vld [vmem:[#allocation3 + $0x158] sm:$0xf0]  ;;  %v2439_v51 = vld [vmem:[#allocation3 + $0x3ac] sm:$0xf] }
  0x8a   :  { %1452 = vmatpush.bf16.msra.mxu2 %v1681_v56  ;;  %1421 = vmatmul.bf16.vlgmr.msrb.gmra.mxu3 %v2597_v32  ;;  %v2109_v56 = vor.u32 %v2461_v48, %v2108_v46  ;;  %v1729_v62 = vor.u32 %v2363_v54, %v1726_v55  ;;  %v2049_v46 = vor.u32 %v2443_v37, %v2046_v39  ;;  %v2471_v54 = vld [vmem:[#allocation3 + $0x4ac] sm:$0xf]  ;;  %v2158_v55 = vld [vmem:[#allocation3 + $0x4b8] sm:$0xf0] }
  0x8b   :  { %1465 = vmatpush.bf16.msra.mxu3 %v1809_v60  ;;  %v2457_v60 = vld [vmem:[#allocation3 + $0x434] sm:$0xf0]  ;;  %v2177_v48 = vor.u32 %v2475_v40, %v2174_v41  ;;  %v2431_v9 = vld [vmem:[#allocation3 + $0x36c] sm:$0xf]  ;;  %v1838_v37 = vld [vmem:[#allocation3 + $0x238] sm:$0xf0] }
  0x8c   :  { %1427 = vmatpush.bf16.msra.mxu0 %v2173_v2  ;;  %v2359_v2 = vld [vmem:[#allocation3 + $0x12c] sm:$0xf]  ;;  %v1966_v41 = vld [vmem:[#allocation3 + $0x338] sm:$0xf0] }
  0x8d   :  { %1440 = vmatpush.bf16.msra.mxu1 %v2301_v3  ;;  %v1710_v3 = vld [vmem:[#allocation3 + $0x138] sm:$0xf0]  ;;  %v2427_v21 = vld [vmem:[#allocation3 + $0x34c] sm:$0xf] }
  0x8e   :  { %1453 = vmatpush.bf16.msra.mxu2 %v1665_v4  ;;  %v2093_v4 = vor.u32 %v2457_v60, %v2092_v59  ;;  %v1713_v12 = vor.u32 %v2359_v2, %v1710_v3  ;;  %v2033_v59 = vor.u32 %v2439_v51, %v2030_v53  ;;  %v2161_v60 = vor.u32 %v2471_v54, %v2158_v55  ;;  %v2467_v2 = vld [vmem:[#allocation3 + $0x48c] sm:$0xf]  ;;  %v1950_v55 = vld [vmem:[#allocation3 + $0x318] sm:$0xf0] }
  0x8f   :  { %1466 = vmatpush.bf16.msra.mxu3 %v1793_v8  ;;  %v1585_v8 = vor.u32 %v2327_v0, %v1582_v1  ;;  %v2014_v1 = vld [vmem:[#allocation3 + $0x398] sm:$0xf0]  ;;  %v2499_v3 = vld [vmem:[#allocation3 + $0x58c] sm:$0xf] }
  0x90   :  { %1428 = vmatpush.bf16.msra.mxu0 %v2157_v14  ;;  %v2355_v14 = vld [vmem:[#allocation3 + $0x10c] sm:$0xf]  ;;  %v2017_v5 = vor.u32 %v2435_v63, %v2014_v1 }
  0x91   :  { %1441 = vmatpush.bf16.msra.mxu1 %v2285_v15  ;;  %v1694_v15 = vld [vmem:[#allocation3 + $0x118] sm:$0xf0]  ;;  %v2387_v51 = vld [vmem:[#allocation3 + $0x20c] sm:$0xf] }
  0x92   :  { %1454 = vmatpush.bf16.msra.mxu2 %v1649_v16  ;;  %v2415_v16 = vld [vmem:[#allocation3 + $0x2ec] sm:$0xf] }
  0x93   :  { %1467 = vmatpush.bf16.msra.mxu3 %v1777_v20  ;;  %v2062_v20 = vld [vmem:[#allocation3 + $0x3f8] sm:$0xf0]  ;;  %v2419_v53 = vld [vmem:[#allocation3 + $0x30c] sm:$0xf] }
  0x94   :  { %1429 = vmatpush.bf16.msra.mxu0 %v2141_v28  ;;  %v2318_v28 = vld [vmem:[#allocation3 + $0x5f8] sm:$0xf0]  ;;  %v2065_v31 = vor.u32 %v2447_v18, %v2062_v20 }
  0x95   :  { %1442 = vmatpush.bf16.msra.mxu1 %v2269_v29  ;;  %v1697_v29 = vor.u32 %v2355_v14, %v1694_v15  ;;  %v2321_v38 = vor.u32 %v2511_v26, %v2318_v28  ;;  %v2495_v14 = vld [vmem:[#allocation3 + $0x56c] sm:$0xf]  ;;  %v2254_v15 = vld [vmem:[#allocation3 + $0x578] sm:$0xf0] }
  0x96   :  { %1455 = vmatpush.bf16.msra.mxu2 %v1633_v30  ;;  %v1937_v30 = vor.u32 %v2415_v16, %v1934_v17  ;;  %v2001_v17 = vor.u32 %v2431_v9, %v1998_v11  ;;  %v1854_v20 = vld [vmem:[#allocation3 + $0x258] sm:$0xf0]  ;;  %v2257_v23 = vor.u32 %v2495_v14, %v2254_v15  ;;  %v2491_v28 = vld [vmem:[#allocation3 + $0x54c] sm:$0xf] }
  0x97   :  { %1468 = vmatpush.bf16.msra.mxu3 %v1761_v36  ;;  %v1918_v36 = vld [vmem:[#allocation3 + $0x2d8] sm:$0xf0] }
  0x98   :  { %1430 = vmatpush.bf16.msra.mxu0 %v2125_v42  ;;  %v2507_v42 = vld [vmem:[#allocation3 + $0x5cc] sm:$0xf]  ;;  %v2110_v26 = vld [vmem:[#allocation3 + $0x458] sm:$0xf0] }
  0x99   :  { %1443 = vmatpush.bf16.msra.mxu1 %v2253_v43  ;;  %v2302_v43 = vld [vmem:[#allocation3 + $0x5d8] sm:$0xf0] }
  0x9a   :  { %1456 = vmatpush.bf16.msra.mxu2 %v1617_v45  ;;  %v1921_v45 = vor.u32 %v2411_v35, %v1918_v36  ;;  %v2305_v52 = vor.u32 %v2507_v42, %v2302_v43  ;;  %v2391_v36 = vld [vmem:[#allocation3 + $0x22c] sm:$0xf]  ;;  %v2094_v43 = vld [vmem:[#allocation3 + $0x438] sm:$0xf0] }
  0x9b   :  { %1469 = vmatpush.bf16.msra.mxu3 %v1745_v50  ;;  %v1902_v50 = vld [vmem:[#allocation3 + $0x2b8] sm:$0xf0]  ;;  %v2455_v42 = vld [vmem:[#allocation3 + $0x42c] sm:$0xf] }
  0x9c   :  { %1431 = vmatpush.bf16.msra.mxu0 %v2109_v56  ;;  %v2503_v56 = vld [vmem:[#allocation3 + $0x5ac] sm:$0xf] }
  0x9d   :  { %1444 = vmatpush.bf16.msra.mxu1 %v2237_v57  ;;  %v2286_v57 = vld [vmem:[#allocation3 + $0x5b8] sm:$0xf0] }
  0x9e   :  { %1457 = vmatpush.bf16.msra.mxu2 %v1601_v58  ;;  %v1905_v58 = vor.u32 %v2407_v49, %v1902_v50  ;;  %v2289_v0 = vor.u32 %v2503_v56, %v2286_v57  ;;  %v2097_v50 = vor.u32 %v2455_v42, %v2094_v43  ;;  %v2451_v56 = vld [vmem:[#allocation3 + $0x40c] sm:$0xf]  ;;  %v2078_v57 = vld [vmem:[#allocation3 + $0x418] sm:$0xf0] }
  0x9f   :  { %1470 = vmatpush.bf16.msra.mxu3 %v1729_v62  ;;  %v1886_v62 = vld [vmem:[#allocation3 + $0x298] sm:$0xf0]  ;;  %v2081_v1 = vor.u32 %v2451_v56, %v2078_v57 }
  0xa0   :  { %1432 = vmatpush.bf16.msra.mxu0 %v2093_v4  ;;  %v1889_v4 = vor.u32 %v2403_v61, %v1886_v62  ;;  %v2206_v61 = vld [vmem:[#allocation3 + $0x518] sm:$0xf0] }
  0xa1   :  { %1445 = vmatpush.bf16.msra.mxu1 %v2221_v7  ;;  %v2399_v7 = vld [vmem:[#allocation3 + $0x26c] sm:$0xf] }
  0xa2   :  { %1458 = vmatpush.bf16.msra.mxu2 %v1585_v8  ;;  %v1870_v8 = vld [vmem:[#allocation3 + $0x278] sm:$0xf0] }
  0xa3   :  { %1471 = vmatpush.bf16.msra.mxu3 %v1713_v12  ;;  %v2463_v12 = vld [vmem:[#allocation3 + $0x46c] sm:$0xf]  ;;  %v1873_v16 = vor.u32 %v2399_v7, %v1870_v8 }
  0xa4   :  { %1433 = vmatpush.bf16.msra.mxu0 %v2077_v19  ;;  %v2129_v18 = vor.u32 %v2463_v12, %v2126_v13  ;;  %v2395_v19 = vld [vmem:[#allocation3 + $0x24c] sm:$0xf] }
  0xa5   :  { %1446 = vmatpush.bf16.msra.mxu1 %v2205_v24  ;;  %v1982_v24 = vld [vmem:[#allocation3 + $0x358] sm:$0xf0] }
  0xa6   :  { %1459 = vmatpush.bf16.msra.mxu2 %v1569_v25  ;;  %v2459_v25 = vld [vmem:[#allocation3 + $0x44c] sm:$0xf] }
  0xa7   :  { %1472 = vmatpush.bf16.msra.mxu3 %v1697_v29  ;;  %1434 = vmatmul.bf16.vlgmr.msra.gmra.mxu0 %v2617_v44  ;;  %v2238_v29 = vld [vmem:[#allocation3 + $0x558] sm:$0xf0]  ;;  %v2113_v35 = vor.u32 %v2459_v25, %v2110_v26 }
  0xa8   :  { %1478 = vmatpush.bf16.msrb.mxu0 %v1937_v30  ;;  %1447 = vmatmul.bf16.vlgmr.msra.gmra.mxu1 %v2619_v47  ;;  %v1240_v39 = vpop.f32.mrf.mxu1  ;;  %v2241_v40 = vor.u32 %v2491_v28, %v2238_v29 }
  0xa9   :  { %1491 = vmatpush.bf16.msrb.mxu1 %v2065_v31  ;;  %1460 = vmatmul.bf16.vlgmr.msra.gmra.mxu2 %v2593_v22  ;;  %v2142_v22 = vld [vmem:[#allocation3 + $0x498] sm:$0xf0]  ;;  %v1857_v31 = vor.u32 %v2395_v19, %v1854_v20 }
  0xaa   :  { %1504 = vmatpush.bf16.msrb.mxu2 %v2193_v34  ;;  %1473 = vmatmul.bf16.vlgmr.msra.gmra.mxu3 %v2599_v33  ;;  %v2270_v33 = vld [vmem:[#allocation3 + $0x598] sm:$0xf0]  ;;  %v2145_v6 = vor.u32 %v2467_v2, %v2142_v22  ;;  %v1985_v34 = vor.u32 %v2427_v21, %v1982_v24 }
  0xab   :  { %1517 = vmatpush.bf16.msrb.mxu3 %v2321_v38  ;;  %v2273_v10 = vor.u32 %v2499_v3, %v2270_v33  ;;  %v2423_v38 = vld [vmem:[#allocation3 + $0x32c] sm:$0xf] }
  0xac   :  { %1479 = vmatpush.bf16.msrb.mxu0 %v1921_v45  ;;  %v2487_v45 = vld [vmem:[#allocation3 + $0x52c] sm:$0xf]  ;;  %v1969_v49 = vor.u32 %v2423_v38, %v1966_v41 }
  0xad   :  { %1492 = vmatpush.bf16.msrb.mxu1 %v2049_v46  ;;  %v2222_v46 = vld [vmem:[#allocation3 + $0x538] sm:$0xf0] }
  0xae   :  { %1505 = vmatpush.bf16.msrb.mxu2 %v2177_v48  ;;  %v1841_v48 = vor.u32 %v2391_v36, %v1838_v37  ;;  %v2225_v54 = vor.u32 %v2487_v45, %v2222_v46 }
  0xaf   :  { %1518 = vmatpush.bf16.msrb.mxu3 %v2305_v52  ;;  %v1822_v52 = vld [vmem:[#allocation3 + $0x218] sm:$0xf0] }
  0xb0   :  { %1480 = vmatpush.bf16.msrb.mxu0 %v1905_v58  ;;  %v1227_v30 = vpop.f32.mrf.mxu0  ;;  %v1825_v63 = vor.u32 %v2387_v51, %v1822_v52  ;;  %v1242_v2 = vpop.f32.mrf.mxu1 }
  0xb1   :  { %1493 = vmatpush.bf16.msrb.mxu1 %v2033_v59  ;;  %v1266_v59 = vpop.f32.mrf.mxu3  ;;  %v1241_v3 = vadd.f32 %v1240_v39, %v1227_v30 }
  0xb2   :  { %1506 = vmatpush.bf16.msrb.mxu2 %v2161_v60  ;;  %v2483_v60 = vld [vmem:[#allocation3 + $0x50c] sm:$0xf] }
  0xb3   :  { %1519 = vmatpush.bf16.msrb.mxu3 %v2289_v0  ;;  %v1953_v0 = vor.u32 %v2419_v53, %v1950_v55  ;;  %v2209_v22 = vor.u32 %v2483_v60, %v2206_v61 }
  0xb4   :  { %1481 = vmatpush.bf16.msrb.mxu0 %v1889_v4 }
  0xb5   :  { %1494 = vmatpush.bf16.msrb.mxu1 %v2017_v5 }
  0xb6   :  { %1507 = vmatpush.bf16.msrb.mxu2 %v2145_v6 }
  0xb7   :  { %1520 = vmatpush.bf16.msrb.mxu3 %v2273_v10  ;;  %v1253_v58 = vpop.f32.mrf.mxu2 }
  0xb8   :  { %1482 = vmatpush.bf16.msrb.mxu0 %v1873_v16  ;;  %v1229_v62 = vpop.f32.mrf.mxu0  ;;  %v1254_v33 = vadd.f32 %v1253_v58, %v1241_v3 }
  0xb9   :  { %1495 = vmatpush.bf16.msrb.mxu1 %v2001_v17  ;;  %v1268_v5 = vpop.f32.mrf.mxu3 }
  0xba   :  { %1508 = vmatpush.bf16.msrb.mxu2 %v2129_v18  ;;  %v1267_v6 = vadd.f32 %v1266_v59, %v1254_v33 }
  0xbb   :  { %1521 = vmatpush.bf16.msrb.mxu3 %v2257_v23 }
  0xbc   :  { %1483 = vmatpush.bf16.msrb.mxu0 %v1857_v31 }
  0xbd   :  { %1496 = vmatpush.bf16.msrb.mxu1 %v1985_v34 }
  0xbe   :  { %1509 = vmatpush.bf16.msrb.mxu2 %v2113_v35 }
  0xbf   :  { %1522 = vmatpush.bf16.msrb.mxu3 %v2241_v40  ;;  %v1255_v4 = vpop.f32.mrf.mxu2 }
  0xc0   :  { %1484 = vmatpush.bf16.msrb.mxu0 %v1841_v48 }
  0xc1   :  { %1497 = vmatpush.bf16.msrb.mxu1 %v1969_v49 }
  0xc2   :  { %1510 = vmatpush.bf16.msrb.mxu2 %v2097_v50 }
  0xc3   :  { %1523 = vmatpush.bf16.msrb.mxu3 %v2225_v54 }
  0xc4   :  { %1485 = vmatpush.bf16.msrb.mxu0 %v1825_v63  ;;  %v1279_v7 = vpop.f32.mrf.mxu0 }
  0xc5   :  { %1498 = vmatpush.bf16.msrb.mxu1 %v1953_v0  ;;  %v1280_v8 = vadd.f32 %v1279_v7, %v1267_v6  ;;  %v1292_v9 = vpop.f32.mrf.mxu1 }
  0xc6   :  { %1511 = vmatpush.bf16.msrb.mxu2 %v2081_v1 }
  0xc7   :  { %1524 = vmatpush.bf16.msrb.mxu3 %v2209_v22  ;;  %1486 = vmatmul.bf16.vlgmr.msrb.gmra.mxu0 %v2595_v27  ;;  %v1293_v10 = vadd.f32 %v1292_v9, %v1280_v8 }
  0xc8   :  { %1499 = vmatmul.bf16.vlgmr.msrb.gmra.mxu1 %v2597_v32 }
  0xc9   :  { %1512 = vmatmul.bf16.vlgmr.msrb.gmra.mxu2 %v2617_v44  ;;  %1545 = vst [vmem:[%s2656_s3] sm:$0xff] %v1293_v10 }
  0xca   :  { %1525 = vmatmul.bf16.vlgmr.msrb.gmra.mxu3 %v2619_v47 }
  0xcc   :  { %v1305_v11 = vpop.f32.mrf.mxu2  ;;  %v1281_v13 = vpop.f32.mrf.mxu0 }
  0xcd   :  { %v1318_v12 = vpop.f32.mrf.mxu3  ;;  %v1294_v14 = vpop.f32.mrf.mxu1 }
  0xce   :  { %v1319_v32 = vadd.f32 %v1318_v12, %v1305_v11 }
  0xd4   :  { %v1307_v27 = vpop.f32.mrf.mxu2 }
  0xd5   :  { %v1320_v15 = vpop.f32.mrf.mxu3 }
  0xe4   :  { %v1331_v16 = vpop.f32.mrf.mxu0 }
  0xe5   :  { %v1332_v44 = vadd.f32 %v1331_v16, %v1319_v32  ;;  %v1344_v17 = vpop.f32.mrf.mxu1 }
  0xe7   :  { %v1345_v47 = vadd.f32 %v1344_v17, %v1332_v44 }
  0xec   :  { %v1357_v18 = vpop.f32.mrf.mxu2  ;;  %v1333_v23 = vpop.f32.mrf.mxu0 }
  0xed   :  { %v1358_v19 = vadd.f32 %v1357_v18, %v1345_v47  ;;  %v1370_v20 = vpop.f32.mrf.mxu3  ;;  %v1346_v24 = vpop.f32.mrf.mxu1 }
  0xef   :  { %v1371_v21 = vadd.f32 %v1370_v20, %v1358_v19 }
  0xf1   :  { %1546 = vst [vmem:[%s2656_s3 + $0x8] sm:$0xff] %v1371_v21 }
  0xf4   :  { %v1359_v25 = vpop.f32.mrf.mxu2 }
  0xf5   :  { %v1372_v26 = vpop.f32.mrf.mxu3 }
 0x104   :  { %v1383_v28 = vpop.f32.mrf.mxu0 }
 0x105   :  { %v1396_v29 = vpop.f32.mrf.mxu1 }
 0x106   :  { %v1397_v38 = vadd.f32 %v1396_v29, %v1383_v28 }
 0x10c   :  { %v1409_v30 = vpop.f32.mrf.mxu2  ;;  %v1385_v34 = vpop.f32.mrf.mxu0 }
 0x10d   :  { %v1422_v31 = vpop.f32.mrf.mxu3  ;;  %v1398_v35 = vpop.f32.mrf.mxu1  ;;  %v1410_v39 = vadd.f32 %v1409_v30, %v1397_v38 }
 0x10f   :  { %v1423_v40 = vadd.f32 %v1422_v31, %v1410_v39 }
 0x114   :  { %v1411_v36 = vpop.f32.mrf.mxu2 }
 0x115   :  { %v1424_v37 = vpop.f32.mrf.mxu3 }
 0x124   :  { %v1435_v41 = vpop.f32.mrf.mxu0 }
 0x125   :  { %v1436_v42 = vadd.f32 %v1435_v41, %v1423_v40  ;;  %v1448_v43 = vpop.f32.mrf.mxu1 }
 0x127   :  { %v1449_v45 = vadd.f32 %v1448_v43, %v1436_v42 }
 0x129   :  { %1547 = vst [vmem:[%s2656_s3 + $0x10] sm:$0xff] %v1449_v45 }
 0x12c   :  { %v1461_v46 = vpop.f32.mrf.mxu2  ;;  %v1437_v49 = vpop.f32.mrf.mxu0 }
 0x12d   :  { %v1474_v48 = vpop.f32.mrf.mxu3  ;;  %v1450_v50 = vpop.f32.mrf.mxu1 }
 0x12e   :  { %v1475_v53 = vadd.f32 %v1474_v48, %v1461_v46 }
 0x134   :  { %v1463_v51 = vpop.f32.mrf.mxu2 }
 0x135   :  { %v1476_v52 = vpop.f32.mrf.mxu3 }
 0x144   :  { %v1487_v54 = vpop.f32.mrf.mxu0 }
 0x145   :  { %v1500_v55 = vpop.f32.mrf.mxu1  ;;  %v1488_v56 = vadd.f32 %v1487_v54, %v1475_v53 }
 0x147   :  { %v1501_v57 = vadd.f32 %v1500_v55, %v1488_v56 }
 0x14c   :  { %v1513_v58 = vpop.f32.mrf.mxu2  ;;  %v1489_v61 = vpop.f32.mrf.mxu0 }
 0x14d   :  { %v1514_v59 = vadd.f32 %v1513_v58, %v1501_v57  ;;  %v1526_v60 = vpop.f32.mrf.mxu3  ;;  %v1502_v62 = vpop.f32.mrf.mxu1 }
 0x14f   :  { %v1527_v63 = vadd.f32 %v1526_v60, %v1514_v59 }
 0x151   :  { %1548 = vst [vmem:[%s2656_s3 + $0x18] sm:$0xff] %v1527_v63 }
 0x154   :  { %v1515_v0 = vpop.f32.mrf.mxu2 }
 0x155   :  { %v1528_v1 = vpop.f32.mrf.mxu3 }
 0x156   :  { %1553 = vsyncpa [#allocation4], 1 }

</bundles_post_ra>
